<compile_context>
chip_gen: v7x
topology: tpu7x:2x2x1
jax: 0.10.0
libtpu: 0.0.40
codegen_flags: <defaults>
</compile_context>

<pallas_src>
import math
from functools import partial

import jax
import jax.numpy as jnp
from jax.experimental import pallas as pl
from jax.experimental.pallas import tpu as pltpu


# ----------------------------------------------------------------------------
# The single fused kernel
# ----------------------------------------------------------------------------
def _gene_vae_kernel(x_ref, eps_bio_ref, eps_size_ref, eps_batch_ref, *refs,
                     treedef, n_params, latent, out_sz):
    param_refs = refs[:n_params]
    out_refs = refs[n_params:]
    fp = jax.tree_util.tree_unflatten(treedef, list(param_refs))
    (o_bio_z, o_mu1, o_lv1,
     o_batch_z, o_batch_mu, o_batch_lv,
     o_bio_pred, o_batch_pred,
     o_mean, o_disp, o_pi,
     o_sf, o_size_mu, o_size_lv) = out_refs

    L = latent
    OUT = out_sz

    def matmul(a, w_ref):
        # bf16 (or stored-dtype) matmul inputs, f32 accumulation on the MXU.
        return jnp.dot(a.astype(w_ref.dtype), w_ref[...],
                       preferred_element_type=jnp.float32)

    x = x_ref[...]

    # ---- fused first hidden layer of the 3 encoders (bio | size | batch) ----
    h = jnp.maximum(matmul(x, fp["enc1_w"]) + fp["enc1_b"][...], 0.0)

    # ---- fused block-diagonal mu/logvar heads of all 3 encoders ----
    heads = matmul(h, fp["heads_w"]) + fp["heads_b"][...]
    mu1 = heads[:, 0:L]
    lv1 = heads[:, L:2 * L]
    batch_mu = heads[:, 2 * L:3 * L]
    batch_lv = heads[:, 3 * L:4 * L]
    size_mu = heads[:, 4 * L:4 * L + 1]
    size_lv = heads[:, 4 * L + 1:4 * L + 2]

    # ---- reparameterization (fused; uses unclamped logvar as in reference) ----
    bio_z = mu1 + jnp.exp(0.5 * lv1) * eps_bio_ref[...]
    size_factor = size_mu + jnp.exp(0.5 * size_lv) * eps_size_ref[...]
    batch_z = batch_mu + jnp.exp(0.5 * batch_lv) * eps_batch_ref[...]

    # ---- classifiers (GRL is identity in the forward pass) ----
    def mlp(z, layers):
        a = z
        for (w_ref, b_ref) in layers[:-1]:
            a = jnp.maximum(matmul(a, w_ref) + b_ref[...], 0.0)
        w_ref, b_ref = layers[-1]
        return matmul(a, w_ref) + b_ref[...]        # raw logits

    bio_pred = mlp(bio_z, fp["cls_bio"])
    batch_pred = mlp(batch_z, fp["cls_batch"])

    # ---- decoder: z_combine = [bio_z, batch_z] via split-weight accumulate ----
    d = (matmul(bio_z, fp["dec1_w_bio"]) + matmul(batch_z, fp["dec1_w_batch"])
         + fp["dec1_b"][...])
    d = jnp.maximum(d, 0.0)
    for (w_ref, b_ref) in fp["dec_rest"]:
        d = jnp.maximum(matmul(d, w_ref) + b_ref[...], 0.0)
    # d is (TB, 1024): decoder output zero-padded from 1000 -> 1024 lanes.

    # ---- fused mean | dispersion | dropout heads: one (1024, 3*OUT) matmul ----
    y = matmul(d, fp["out_heads_w"]) + fp["out_heads_b"][...]

    sf_clamped = jnp.clip(size_factor, -10.0, 10.0)

    # MeanAct: clamp(exp(y), 1e-3, 1e3); clamp y before exp to avoid inf.
    mean = jnp.clip(jnp.exp(jnp.minimum(y[:, 0:OUT], jnp.log(1000.0))),
                    0.001, 1000.0)
    mean = mean * jnp.exp(sf_clamped)
    # DispAct: clamp(softplus(y), 1e-3, 1e3)
    disp = jnp.clip(jax.nn.softplus(y[:, OUT:2 * OUT]), 0.001, 1000.0)
    pi = jax.nn.sigmoid(y[:, 2 * OUT:3 * OUT])

    # ---- write outputs ----
    o_bio_z[...] = bio_z
    o_mu1[...] = mu1
    o_lv1[...] = jnp.clip(lv1, -10.0, 10.0)
    o_batch_z[...] = batch_z
    o_batch_mu[...] = batch_mu
    o_batch_lv[...] = batch_lv
    o_bio_pred[...] = bio_pred
    o_batch_pred[...] = batch_pred
    o_mean[...] = mean
    o_disp[...] = disp
    o_pi[...] = pi
    o_sf[...] = sf_clamped
    o_size_mu[...] = size_mu
    o_size_lv[...] = size_lv


# ----------------------------------------------------------------------------
# Parameter construction (PyTorch nn.Linear default init style)
# ----------------------------------------------------------------------------
def init_linear(key, fan_in, fan_out):
    k1, k2 = jax.random.split(key)
    lim = 1.0 / math.sqrt(fan_in)
    w = jax.random.uniform(k1, (fan_in, fan_out), jnp.float32, -lim, lim)
    b = jax.random.uniform(k2, (1, fan_out), jnp.float32, -lim, lim)
    return w, b


def init_mlp(key, dims):
    layers = []
    for i in range(len(dims) - 1):
        key, sub = jax.random.split(key)
        layers.append(init_linear(sub, dims[i], dims[i + 1]))
    return layers


def init_encoder(key, in_sz, hidden, latent_sz):
    k0, k1, k2 = jax.random.split(key, 3)
    body = init_mlp(k0, [in_sz] + hidden)
    mu_head = init_linear(k1, hidden[-1], latent_sz)
    lv_head = init_linear(k2, hidden[-1], latent_sz)
    return {"body": body, "mu": mu_head, "logvar": lv_head}


def init_classifier(key, latent_sz, hidden, num_classes):
    return init_mlp(key, [latent_sz] + hidden + [num_classes])


def init_decoder(key, in_sz, hidden, out_sz):
    return init_mlp(key, [in_sz] + hidden + [out_sz])


# ----------------------------------------------------------------------------
# One-time fusion / padding / bf16 cast of the raw parameters
# ----------------------------------------------------------------------------
def prepare_fused_params(params, weight_dtype=jnp.bfloat16, dec_pad=1024):
    def wcast(w):
        return w.astype(weight_dtype)

    bio = params["bio_encoder"]
    size = params["size_encoder"]
    batch = params["batch_encoder"]
    for enc in (bio, size, batch):
        assert len(enc["body"]) == 1, "fused kernel assumes one hidden layer per encoder"

    (w_b1, b_b1), = bio["body"]
    (w_s1, b_s1), = size["body"]
    (w_t1, b_t1), = batch["body"]
    Hb, Hs, Ht = w_b1.shape[1], w_s1.shape[1], w_t1.shape[1]
    Hsum = Hb + Hs + Ht
    L = bio["mu"][0].shape[1]
    assert batch["mu"][0].shape[1] == L and size["mu"][0].shape[1] == 1

    # Fused encoder layer-1: columns ordered [bio | size | batch].
    enc1_w = jnp.concatenate([w_b1, w_s1, w_t1], axis=1)
    enc1_b = jnp.concatenate([b_b1, b_s1, b_t1], axis=1)

    # Block-diagonal mu/logvar heads: cols [bio_mu, bio_lv, batch_mu, batch_lv, size_mu, size_lv].
    n_cols = 4 * L + 2
    heads_w = jnp.zeros((Hsum, n_cols), jnp.float32)
    heads_w = heads_w.at[0:Hb, 0:L].set(bio["mu"][0])
    heads_w = heads_w.at[0:Hb, L:2 * L].set(bio["logvar"][0])
    heads_w = heads_w.at[Hb + Hs:Hsum, 2 * L:3 * L].set(batch["mu"][0])
    heads_w = heads_w.at[Hb + Hs:Hsum, 3 * L:4 * L].set(batch["logvar"][0])
    heads_w = heads_w.at[Hb:Hb + Hs, 4 * L:4 * L + 1].set(size["mu"][0])
    heads_w = heads_w.at[Hb:Hb + Hs, 4 * L + 1:4 * L + 2].set(size["logvar"][0])
    heads_b = jnp.concatenate([bio["mu"][1], bio["logvar"][1],
                               batch["mu"][1], batch["logvar"][1],
                               size["mu"][1], size["logvar"][1]], axis=1)

    # Decoder: split first-layer weight by rows (bio vs batch half of z_combine),
    # zero-pad the last layer's output 1000 -> dec_pad for lane-dense matmuls.
    dec = params["decoder"]
    assert len(dec) >= 2, "fused kernel assumes decoder has >= 1 hidden layer"
    w_d1, b_d1 = dec[0]
    assert w_d1.shape[0] == 2 * L
    dec1_w_bio = w_d1[:L]
    dec1_w_batch = w_d1[L:]
    dec_rest = list(dec[1:])
    w_last, b_last = dec_rest[-1]
    K, N = w_last.shape
    if N < dec_pad:
        w_last = jnp.concatenate([w_last, jnp.zeros((K, dec_pad - N), w_last.dtype)], axis=1)
        b_last = jnp.concatenate([b_last, jnp.zeros((1, dec_pad - N), b_last.dtype)], axis=1)
    dec_rest[-1] = (w_last, b_last)

    # Fused output heads [mean | dispersion | dropout], K padded 1000 -> dec_pad.
    wm, bm = params["mean_decoder"]
    wd, bd = params["dispersion_decoder"]
    wp, bp = params["dropout_decoder"]
    OUT = wm.shape[1]
    out_w = jnp.concatenate([wm, wd, wp], axis=1)
    if out_w.shape[0] < dec_pad:
        out_w = jnp.concatenate(
            [out_w, jnp.zeros((dec_pad - out_w.shape[0], 3 * OUT), out_w.dtype)], axis=0)
    out_b = jnp.concatenate([bm, bd, bp], axis=1)

    return {
        "enc1_w": wcast(enc1_w), "enc1_b": enc1_b,
        "heads_w": wcast(heads_w), "heads_b": heads_b,
        "dec1_w_bio": wcast(dec1_w_bio), "dec1_w_batch": wcast(dec1_w_batch),
        "dec1_b": b_d1,
        "dec_rest": [(wcast(w), b) for (w, b) in dec_rest],
        "out_heads_w": wcast(out_w), "out_heads_b": out_b,
        "cls_bio": [(wcast(w), b) for (w, b) in params["bio_classifier"]],
        "cls_batch": [(wcast(w), b) for (w, b) in params["batch_classifier"]],
    }


# ----------------------------------------------------------------------------
# Forward pass (single pallas_call)
# ----------------------------------------------------------------------------
def _round_up(n, m):
    return ((n + m - 1) // m) * m


def gene_vae_forward(fused, x, eps_bio, eps_size, eps_batch):
    B, IN = x.shape
    L = eps_bio.shape[1]
    OUT = fused["out_heads_w"].shape[1] // 3
    NB = fused["cls_bio"][-1][0].shape[1]

    # Batch tiling: multiple of 8 rows; grid over batch shards across TCs (v7x).
    TB = min(_round_up(B, 8), 128)
    B_pad = _round_up(B, TB)
    if B_pad != B:
        pad = B_pad - B
        x = jnp.pad(x, ((0, pad), (0, 0)))
        eps_bio = jnp.pad(eps_bio, ((0, pad), (0, 0)))
        eps_size = jnp.pad(eps_size, ((0, pad), (0, 0)))
        eps_batch = jnp.pad(eps_batch, ((0, pad), (0, 0)))

    flat_params, treedef = jax.tree_util.tree_flatten(fused)

    out_widths = [L, L, L, L, L, L, NB, NB, OUT, OUT, OUT, 1, 1, 1]
    out_shape = tuple(jax.ShapeDtypeStruct((B_pad, w), jnp.float32) for w in out_widths)

    def batch_spec(width):
        return pl.BlockSpec((TB, width), lambda i: (i, 0))

    in_specs = [batch_spec(IN), batch_spec(L), batch_spec(1), batch_spec(L)]
    for a in flat_params:
        in_specs.append(pl.BlockSpec(a.shape, lambda i, nd=a.ndim: (0,) * nd))
    out_specs = tuple(batch_spec(w) for w in out_widths)

    # Advisory cost estimate so XLA schedules the fused call sensibly.
    flops = 0
    bytes_accessed = 0
    for leaf in flat_params:
        bytes_accessed += int(leaf.size) * leaf.dtype.itemsize
        if leaf.ndim == 2 and leaf.shape[0] > 1:
            flops += 2 * B_pad * int(leaf.shape[0]) * int(leaf.shape[1])
    bytes_accessed += 4 * (int(x.size) + int(eps_bio.size) + int(eps_size.size)
                           + int(eps_batch.size))
    bytes_accessed += 4 * B_pad * sum(out_widths)
    transcendentals = B_pad * (4 * L + 4 + 4 * OUT)
    cost = pl.CostEstimate(flops=flops, transcendentals=transcendentals,
                           bytes_accessed=bytes_accessed)

    kernel = partial(_gene_vae_kernel, treedef=treedef, n_params=len(flat_params),
                     latent=L, out_sz=OUT)

    outs = pl.pallas_call(
        kernel,
        grid=(B_pad // TB,),
        in_specs=in_specs,
        out_specs=out_specs,
        out_shape=out_shape,
        compiler_params=pltpu.CompilerParams(dimension_semantics=("parallel",)),
        cost_estimate=cost,
    )(x, eps_bio, eps_size, eps_batch, *flat_params)

    if B_pad != B:
        outs = tuple(o[:B] for o in outs)
    return outs


# ----------------------------------------------------------------------------
# Main
# ----------------------------------------------------------------------------
if __name__ == "__main__":
    # Small synthetic config (use_vamp = False path)
    B = 8            # batch
    IN_SZ = 64       # gene input dimension
    LATENT = 16
    OUT_SZ = 64
    NUM_BATCH = 4
    BIO_HIDDEN = [32]
    BATCH_HIDDEN = [32]
    DEC_HIDDEN = [32]
    CLS_POWER = [32, 16]
    CLS_WEAK = [16]
    DEC_OUT = 1000   # hard-coded in the PyTorch module

    root = jax.random.PRNGKey(0)
    keys = jax.random.split(root, 16)

    params = {
        "bio_encoder":   init_encoder(keys[0], IN_SZ, BIO_HIDDEN, LATENT),
        "batch_encoder": init_encoder(keys[1], IN_SZ, BATCH_HIDDEN, LATENT),
        "size_encoder":  init_encoder(keys[2], IN_SZ, BIO_HIDDEN, 1),
        "decoder":       init_decoder(keys[3], 2 * LATENT, DEC_HIDDEN, DEC_OUT),
        "mean_decoder":       init_linear(keys[4], DEC_OUT, OUT_SZ),
        "dispersion_decoder": init_linear(keys[5], DEC_OUT, OUT_SZ),
        "dropout_decoder":    init_linear(keys[6], DEC_OUT, OUT_SZ),
        "bio_classifier":   init_classifier(keys[7], LATENT, CLS_POWER, NUM_BATCH),
        "batch_classifier": init_classifier(keys[8], LATENT, CLS_WEAK, NUM_BATCH),
    }

    # One-time fusion / padding / bf16 weight cast (outside the jitted hot path).
    fused = jax.block_until_ready(prepare_fused_params(params))

    x = jax.random.normal(keys[9], (B, IN_SZ), jnp.float32)
    eps_bio = jax.random.normal(keys[10], (B, LATENT), jnp.float32)
    eps_size = jax.random.normal(keys[11], (B, 1), jnp.float32)
    eps_batch = jax.random.normal(keys[12], (B, LATENT), jnp.float32)

    fwd = jax.jit(gene_vae_forward)
    outs = fwd(fused, x, eps_bio, eps_size, eps_batch)
    outs = jax.block_until_ready(outs)

    # light sanity checks on shapes / values
    assert outs[0].shape == (B, LATENT)        # bio_z
    assert outs[2].shape == (B, LATENT)        # logvar1 (clamped)
    assert outs[6].shape == (B, NUM_BATCH)     # bio_batch_pred
    assert outs[8].shape == (B, OUT_SZ)        # _mean
    assert outs[9].shape == (B, OUT_SZ)        # _disp
    assert outs[10].shape == (B, OUT_SZ)       # _pi
    assert outs[11].shape == (B, 1)            # size_factor (clamped)
    assert all(bool(jnp.all(jnp.isfinite(o))) for o in outs)

    print("KERNEL_OK")
</pallas_src>

<mosaic_0001>
module attributes {stable_mosaic.version = 11 : i64} {
  func.func @_gene_vae_kernel(%arg0: i32, %arg1: memref<8x64xf32, #tpu.memory_space<vmem>>, %arg2: memref<8x16xf32, #tpu.memory_space<vmem>>, %arg3: memref<8x1xf32, #tpu.memory_space<vmem>>, %arg4: memref<8x16xf32, #tpu.memory_space<vmem>>, %arg5: memref<16x16xbf16, #tpu.memory_space<vmem>>, %arg6: memref<1x16xf32, #tpu.memory_space<vmem>>, %arg7: memref<16x4xbf16, #tpu.memory_space<vmem>>, %arg8: memref<1x4xf32, #tpu.memory_space<vmem>>, %arg9: memref<16x32xbf16, #tpu.memory_space<vmem>>, %arg10: memref<1x32xf32, #tpu.memory_space<vmem>>, %arg11: memref<32x16xbf16, #tpu.memory_space<vmem>>, %arg12: memref<1x16xf32, #tpu.memory_space<vmem>>, %arg13: memref<16x4xbf16, #tpu.memory_space<vmem>>, %arg14: memref<1x4xf32, #tpu.memory_space<vmem>>, %arg15: memref<1x32xf32, #tpu.memory_space<vmem>>, %arg16: memref<16x32xbf16, #tpu.memory_space<vmem>>, %arg17: memref<16x32xbf16, #tpu.memory_space<vmem>>, %arg18: memref<32x1024xbf16, #tpu.memory_space<vmem>>, %arg19: memref<1x1024xf32, #tpu.memory_space<vmem>>, %arg20: memref<1x96xf32, #tpu.memory_space<vmem>>, %arg21: memref<64x96xbf16, #tpu.memory_space<vmem>>, %arg22: memref<1x66xf32, #tpu.memory_space<vmem>>, %arg23: memref<96x66xbf16, #tpu.memory_space<vmem>>, %arg24: memref<1x192xf32, #tpu.memory_space<vmem>>, %arg25: memref<1024x192xbf16, #tpu.memory_space<vmem>>, %arg26: memref<8x16xf32, #tpu.memory_space<vmem>>, %arg27: memref<8x16xf32, #tpu.memory_space<vmem>>, %arg28: memref<8x16xf32, #tpu.memory_space<vmem>>, %arg29: memref<8x16xf32, #tpu.memory_space<vmem>>, %arg30: memref<8x16xf32, #tpu.memory_space<vmem>>, %arg31: memref<8x16xf32, #tpu.memory_space<vmem>>, %arg32: memref<8x4xf32, #tpu.memory_space<vmem>>, %arg33: memref<8x4xf32, #tpu.memory_space<vmem>>, %arg34: memref<8x64xf32, #tpu.memory_space<vmem>>, %arg35: memref<8x64xf32, #tpu.memory_space<vmem>>, %arg36: memref<8x64xf32, #tpu.memory_space<vmem>>, %arg37: memref<8x1xf32, #tpu.memory_space<vmem>>, %arg38: memref<8x1xf32, #tpu.memory_space<vmem>>, %arg39: memref<8x1xf32, #tpu.memory_space<vmem>>) attributes {dimension_semantics = [#tpu.dimension_semantics<parallel>], iteration_bounds = array<i64: 1>, scalar_prefetch = 0 : i64, scratch_operands = 0 : i64, tpu.core_type = #tpu.core_type<tc>, window_params = [{transform_indices = @transform_0, window_bounds = array<i64: 8, 64>}, {transform_indices = @transform_1, window_bounds = array<i64: 8, 16>}, {transform_indices = @transform_2, window_bounds = array<i64: 8, 1>}, {transform_indices = @transform_3, window_bounds = array<i64: 8, 16>}, {pipeline_mode = #tpu.pipeline_mode<synchronous>, transform_indices = @transform_4, window_bounds = array<i64: 16, 16>}, {pipeline_mode = #tpu.pipeline_mode<synchronous>, transform_indices = @transform_5, window_bounds = array<i64: 1, 16>}, {pipeline_mode = #tpu.pipeline_mode<synchronous>, transform_indices = @transform_6, window_bounds = array<i64: 16, 4>}, {pipeline_mode = #tpu.pipeline_mode<synchronous>, transform_indices = @transform_7, window_bounds = array<i64: 1, 4>}, {pipeline_mode = #tpu.pipeline_mode<synchronous>, transform_indices = @transform_8, window_bounds = array<i64: 16, 32>}, {pipeline_mode = #tpu.pipeline_mode<synchronous>, transform_indices = @transform_9, window_bounds = array<i64: 1, 32>}, {pipeline_mode = #tpu.pipeline_mode<synchronous>, transform_indices = @transform_10, window_bounds = array<i64: 32, 16>}, {pipeline_mode = #tpu.pipeline_mode<synchronous>, transform_indices = @transform_11, window_bounds = array<i64: 1, 16>}, {pipeline_mode = #tpu.pipeline_mode<synchronous>, transform_indices = @transform_12, window_bounds = array<i64: 16, 4>}, {pipeline_mode = #tpu.pipeline_mode<synchronous>, transform_indices = @transform_13, window_bounds = array<i64: 1, 4>}, {pipeline_mode = #tpu.pipeline_mode<synchronous>, transform_indices = @transform_14, window_bounds = array<i64: 1, 32>}, {pipeline_mode = #tpu.pipeline_mode<synchronous>, transform_indices = @transform_15, window_bounds = array<i64: 16, 32>}, {pipeline_mode = #tpu.pipeline_mode<synchronous>, transform_indices = @transform_16, window_bounds = array<i64: 16, 32>}, {pipeline_mode = #tpu.pipeline_mode<synchronous>, transform_indices = @transform_17, window_bounds = array<i64: 32, 1024>}, {pipeline_mode = #tpu.pipeline_mode<synchronous>, transform_indices = @transform_18, window_bounds = array<i64: 1, 1024>}, {pipeline_mode = #tpu.pipeline_mode<synchronous>, transform_indices = @transform_19, window_bounds = array<i64: 1, 96>}, {pipeline_mode = #tpu.pipeline_mode<synchronous>, transform_indices = @transform_20, window_bounds = array<i64: 64, 96>}, {pipeline_mode = #tpu.pipeline_mode<synchronous>, transform_indices = @transform_21, window_bounds = array<i64: 1, 66>}, {pipeline_mode = #tpu.pipeline_mode<synchronous>, transform_indices = @transform_22, window_bounds = array<i64: 96, 66>}, {pipeline_mode = #tpu.pipeline_mode<synchronous>, transform_indices = @transform_23, window_bounds = array<i64: 1, 192>}, {pipeline_mode = #tpu.pipeline_mode<synchronous>, transform_indices = @transform_24, window_bounds = array<i64: 1024, 192>}, {transform_indices = @transform_25, window_bounds = array<i64: 8, 16>}, {transform_indices = @transform_26, window_bounds = array<i64: 8, 16>}, {transform_indices = @transform_27, window_bounds = array<i64: 8, 16>}, {transform_indices = @transform_28, window_bounds = array<i64: 8, 16>}, {transform_indices = @transform_29, window_bounds = array<i64: 8, 16>}, {transform_indices = @transform_30, window_bounds = array<i64: 8, 16>}, {transform_indices = @transform_31, window_bounds = array<i64: 8, 4>}, {transform_indices = @transform_32, window_bounds = array<i64: 8, 4>}, {transform_indices = @transform_33, window_bounds = array<i64: 8, 64>}, {transform_indices = @transform_34, window_bounds = array<i64: 8, 64>}, {transform_indices = @transform_35, window_bounds = array<i64: 8, 64>}, {transform_indices = @transform_36, window_bounds = array<i64: 8, 1>}, {transform_indices = @transform_37, window_bounds = array<i64: 8, 1>}, {transform_indices = @transform_38, window_bounds = array<i64: 8, 1>}]} {
    %c0 = arith.constant 0 : index
    %c0_0 = arith.constant 0 : index
    %0 = vector.load %arg1[%c0, %c0_0] : memref<8x64xf32, #tpu.memory_space<vmem>>, vector<8x64xf32>
    %1 = arith.truncf %0 : vector<8x64xf32> to vector<8x64xbf16>
    %c0_1 = arith.constant 0 : index
    %c0_2 = arith.constant 0 : index
    %2 = vector.load %arg21[%c0_1, %c0_2] : memref<64x96xbf16, #tpu.memory_space<vmem>>, vector<64x96xbf16>
    %cst = arith.constant dense<0.000000e+00> : vector<8x96xf32>
    %3 = tpu.matmul %1, %2, %cst {dimension_numbers = #tpu.dot_dimension_numbers<[1], [0], [0], [1], [0, 0, 1, 1], [], []>} : vector<8x64xbf16>, vector<64x96xbf16>, vector<8x96xf32> -> vector<8x96xf32>
    %c0_3 = arith.constant 0 : index
    %c0_4 = arith.constant 0 : index
    %4 = vector.load %arg20[%c0_3, %c0_4] : memref<1x96xf32, #tpu.memory_space<vmem>>, vector<1x96xf32>
    %5 = vector.broadcast %4 : vector<1x96xf32> to vector<8x96xf32>
    %6 = arith.addf %3, %5 : vector<8x96xf32>
    %cst_5 = arith.constant 0.000000e+00 : f32
    %7 = vector.broadcast %cst_5 : f32 to vector<8x96xf32>
    %8 = arith.maximumf %6, %7 : vector<8x96xf32>
    %9 = arith.truncf %8 : vector<8x96xf32> to vector<8x96xbf16>
    %c0_6 = arith.constant 0 : index
    %c0_7 = arith.constant 0 : index
    %10 = vector.load %arg23[%c0_6, %c0_7] : memref<96x66xbf16, #tpu.memory_space<vmem>>, vector<96x66xbf16>
    %cst_8 = arith.constant dense<0.000000e+00> : vector<8x66xf32>
    %11 = tpu.matmul %9, %10, %cst_8 {dimension_numbers = #tpu.dot_dimension_numbers<[1], [0], [0], [1], [0, 0, 1, 1], [], []>} : vector<8x96xbf16>, vector<96x66xbf16>, vector<8x66xf32> -> vector<8x66xf32>
    %c0_9 = arith.constant 0 : index
    %c0_10 = arith.constant 0 : index
    %12 = vector.load %arg22[%c0_9, %c0_10] : memref<1x66xf32, #tpu.memory_space<vmem>>, vector<1x66xf32>
    %13 = vector.broadcast %12 : vector<1x66xf32> to vector<8x66xf32>
    %14 = arith.addf %11, %13 : vector<8x66xf32>
    %15 = vector.extract_strided_slice %14 {offsets = [0, 0], sizes = [8, 16], strides = [1, 1]} : vector<8x66xf32> to vector<8x16xf32>
    %16 = vector.extract_strided_slice %14 {offsets = [0, 16], sizes = [8, 16], strides = [1, 1]} : vector<8x66xf32> to vector<8x16xf32>
    %17 = vector.extract_strided_slice %14 {offsets = [0, 32], sizes = [8, 16], strides = [1, 1]} : vector<8x66xf32> to vector<8x16xf32>
    %18 = vector.extract_strided_slice %14 {offsets = [0, 48], sizes = [8, 16], strides = [1, 1]} : vector<8x66xf32> to vector<8x16xf32>
    %19 = vector.extract_strided_slice %14 {offsets = [0, 64], sizes = [8, 1], strides = [1, 1]} : vector<8x66xf32> to vector<8x1xf32>
    %20 = vector.extract_strided_slice %14 {offsets = [0, 65], sizes = [8, 1], strides = [1, 1]} : vector<8x66xf32> to vector<8x1xf32>
    %cst_11 = arith.constant 5.000000e-01 : f32
    %21 = vector.broadcast %cst_11 : f32 to vector<8x16xf32>
    %22 = arith.mulf %21, %16 : vector<8x16xf32>
    %23 = math.exp %22 : vector<8x16xf32>
    %c0_12 = arith.constant 0 : index
    %c0_13 = arith.constant 0 : index
    %24 = vector.load %arg2[%c0_12, %c0_13] : memref<8x16xf32, #tpu.memory_space<vmem>>, vector<8x16xf32>
    %25 = arith.mulf %23, %24 : vector<8x16xf32>
    %26 = arith.addf %15, %25 : vector<8x16xf32>
    %cst_14 = arith.constant 5.000000e-01 : f32
    %27 = vector.broadcast %cst_14 : f32 to vector<8x1xf32>
    %28 = arith.mulf %27, %20 : vector<8x1xf32>
    %29 = math.exp %28 : vector<8x1xf32>
    %c0_15 = arith.constant 0 : index
    %c0_16 = arith.constant 0 : index
    %30 = vector.load %arg3[%c0_15, %c0_16] : memref<8x1xf32, #tpu.memory_space<vmem>>, vector<8x1xf32>
    %31 = arith.mulf %29, %30 : vector<8x1xf32>
    %32 = arith.addf %19, %31 : vector<8x1xf32>
    %cst_17 = arith.constant 5.000000e-01 : f32
    %33 = vector.broadcast %cst_17 : f32 to vector<8x16xf32>
    %34 = arith.mulf %33, %18 : vector<8x16xf32>
    %35 = math.exp %34 : vector<8x16xf32>
    %c0_18 = arith.constant 0 : index
    %c0_19 = arith.constant 0 : index
    %36 = vector.load %arg4[%c0_18, %c0_19] : memref<8x16xf32, #tpu.memory_space<vmem>>, vector<8x16xf32>
    %37 = arith.mulf %35, %36 : vector<8x16xf32>
    %38 = arith.addf %17, %37 : vector<8x16xf32>
    %39 = arith.truncf %26 : vector<8x16xf32> to vector<8x16xbf16>
    %c0_20 = arith.constant 0 : index
    %c0_21 = arith.constant 0 : index
    %40 = vector.load %arg9[%c0_20, %c0_21] : memref<16x32xbf16, #tpu.memory_space<vmem>>, vector<16x32xbf16>
    %cst_22 = arith.constant dense<0.000000e+00> : vector<8x32xf32>
    %41 = tpu.matmul %39, %40, %cst_22 {dimension_numbers = #tpu.dot_dimension_numbers<[1], [0], [0], [1], [0, 0, 1, 1], [], []>} : vector<8x16xbf16>, vector<16x32xbf16>, vector<8x32xf32> -> vector<8x32xf32>
    %c0_23 = arith.constant 0 : index
    %c0_24 = arith.constant 0 : index
    %42 = vector.load %arg10[%c0_23, %c0_24] : memref<1x32xf32, #tpu.memory_space<vmem>>, vector<1x32xf32>
    %43 = vector.broadcast %42 : vector<1x32xf32> to vector<8x32xf32>
    %44 = arith.addf %41, %43 : vector<8x32xf32>
    %cst_25 = arith.constant 0.000000e+00 : f32
    %45 = vector.broadcast %cst_25 : f32 to vector<8x32xf32>
    %46 = arith.maximumf %44, %45 : vector<8x32xf32>
    %47 = arith.truncf %46 : vector<8x32xf32> to vector<8x32xbf16>
    %c0_26 = arith.constant 0 : index
    %c0_27 = arith.constant 0 : index
    %48 = vector.load %arg11[%c0_26, %c0_27] : memref<32x16xbf16, #tpu.memory_space<vmem>>, vector<32x16xbf16>
    %cst_28 = arith.constant dense<0.000000e+00> : vector<8x16xf32>
    %49 = tpu.matmul %47, %48, %cst_28 {dimension_numbers = #tpu.dot_dimension_numbers<[1], [0], [0], [1], [0, 0, 1, 1], [], []>} : vector<8x32xbf16>, vector<32x16xbf16>, vector<8x16xf32> -> vector<8x16xf32>
    %c0_29 = arith.constant 0 : index
    %c0_30 = arith.constant 0 : index
    %50 = vector.load %arg12[%c0_29, %c0_30] : memref<1x16xf32, #tpu.memory_space<vmem>>, vector<1x16xf32>
    %51 = vector.broadcast %50 : vector<1x16xf32> to vector<8x16xf32>
    %52 = arith.addf %49, %51 : vector<8x16xf32>
    %cst_31 = arith.constant 0.000000e+00 : f32
    %53 = vector.broadcast %cst_31 : f32 to vector<8x16xf32>
    %54 = arith.maximumf %52, %53 : vector<8x16xf32>
    %55 = arith.truncf %54 : vector<8x16xf32> to vector<8x16xbf16>
    %c0_32 = arith.constant 0 : index
    %c0_33 = arith.constant 0 : index
    %56 = vector.load %arg13[%c0_32, %c0_33] : memref<16x4xbf16, #tpu.memory_space<vmem>>, vector<16x4xbf16>
    %cst_34 = arith.constant dense<0.000000e+00> : vector<8x4xf32>
    %57 = tpu.matmul %55, %56, %cst_34 {dimension_numbers = #tpu.dot_dimension_numbers<[1], [0], [0], [1], [0, 0, 1, 1], [], []>} : vector<8x16xbf16>, vector<16x4xbf16>, vector<8x4xf32> -> vector<8x4xf32>
    %c0_35 = arith.constant 0 : index
    %c0_36 = arith.constant 0 : index
    %58 = vector.load %arg14[%c0_35, %c0_36] : memref<1x4xf32, #tpu.memory_space<vmem>>, vector<1x4xf32>
    %59 = vector.broadcast %58 : vector<1x4xf32> to vector<8x4xf32>
    %60 = arith.addf %57, %59 : vector<8x4xf32>
    %61 = arith.truncf %38 : vector<8x16xf32> to vector<8x16xbf16>
    %c0_37 = arith.constant 0 : index
    %c0_38 = arith.constant 0 : index
    %62 = vector.load %arg5[%c0_37, %c0_38] : memref<16x16xbf16, #tpu.memory_space<vmem>>, vector<16x16xbf16>
    %cst_39 = arith.constant dense<0.000000e+00> : vector<8x16xf32>
    %63 = tpu.matmul %61, %62, %cst_39 {dimension_numbers = #tpu.dot_dimension_numbers<[1], [0], [0], [1], [0, 0, 1, 1], [], []>} : vector<8x16xbf16>, vector<16x16xbf16>, vector<8x16xf32> -> vector<8x16xf32>
    %c0_40 = arith.constant 0 : index
    %c0_41 = arith.constant 0 : index
    %64 = vector.load %arg6[%c0_40, %c0_41] : memref<1x16xf32, #tpu.memory_space<vmem>>, vector<1x16xf32>
    %65 = vector.broadcast %64 : vector<1x16xf32> to vector<8x16xf32>
    %66 = arith.addf %63, %65 : vector<8x16xf32>
    %cst_42 = arith.constant 0.000000e+00 : f32
    %67 = vector.broadcast %cst_42 : f32 to vector<8x16xf32>
    %68 = arith.maximumf %66, %67 : vector<8x16xf32>
    %69 = arith.truncf %68 : vector<8x16xf32> to vector<8x16xbf16>
    %c0_43 = arith.constant 0 : index
    %c0_44 = arith.constant 0 : index
    %70 = vector.load %arg7[%c0_43, %c0_44] : memref<16x4xbf16, #tpu.memory_space<vmem>>, vector<16x4xbf16>
    %cst_45 = arith.constant dense<0.000000e+00> : vector<8x4xf32>
    %71 = tpu.matmul %69, %70, %cst_45 {dimension_numbers = #tpu.dot_dimension_numbers<[1], [0], [0], [1], [0, 0, 1, 1], [], []>} : vector<8x16xbf16>, vector<16x4xbf16>, vector<8x4xf32> -> vector<8x4xf32>
    %c0_46 = arith.constant 0 : index
    %c0_47 = arith.constant 0 : index
    %72 = vector.load %arg8[%c0_46, %c0_47] : memref<1x4xf32, #tpu.memory_space<vmem>>, vector<1x4xf32>
    %73 = vector.broadcast %72 : vector<1x4xf32> to vector<8x4xf32>
    %74 = arith.addf %71, %73 : vector<8x4xf32>
    %75 = arith.truncf %26 : vector<8x16xf32> to vector<8x16xbf16>
    %c0_48 = arith.constant 0 : index
    %c0_49 = arith.constant 0 : index
    %76 = vector.load %arg17[%c0_48, %c0_49] : memref<16x32xbf16, #tpu.memory_space<vmem>>, vector<16x32xbf16>
    %cst_50 = arith.constant dense<0.000000e+00> : vector<8x32xf32>
    %77 = tpu.matmul %75, %76, %cst_50 {dimension_numbers = #tpu.dot_dimension_numbers<[1], [0], [0], [1], [0, 0, 1, 1], [], []>} : vector<8x16xbf16>, vector<16x32xbf16>, vector<8x32xf32> -> vector<8x32xf32>
    %78 = arith.truncf %38 : vector<8x16xf32> to vector<8x16xbf16>
    %c0_51 = arith.constant 0 : index
    %c0_52 = arith.constant 0 : index
    %79 = vector.load %arg16[%c0_51, %c0_52] : memref<16x32xbf16, #tpu.memory_space<vmem>>, vector<16x32xbf16>
    %cst_53 = arith.constant dense<0.000000e+00> : vector<8x32xf32>
    %80 = tpu.matmul %78, %79, %cst_53 {dimension_numbers = #tpu.dot_dimension_numbers<[1], [0], [0], [1], [0, 0, 1, 1], [], []>} : vector<8x16xbf16>, vector<16x32xbf16>, vector<8x32xf32> -> vector<8x32xf32>
    %81 = arith.addf %77, %80 : vector<8x32xf32>
    %c0_54 = arith.constant 0 : index
    %c0_55 = arith.constant 0 : index
    %82 = vector.load %arg15[%c0_54, %c0_55] : memref<1x32xf32, #tpu.memory_space<vmem>>, vector<1x32xf32>
    %83 = vector.broadcast %82 : vector<1x32xf32> to vector<8x32xf32>
    %84 = arith.addf %81, %83 : vector<8x32xf32>
    %cst_56 = arith.constant 0.000000e+00 : f32
    %85 = vector.broadcast %cst_56 : f32 to vector<8x32xf32>
    %86 = arith.maximumf %84, %85 : vector<8x32xf32>
    %87 = arith.truncf %86 : vector<8x32xf32> to vector<8x32xbf16>
    %c0_57 = arith.constant 0 : index
    %c0_58 = arith.constant 0 : index
    %88 = vector.load %arg18[%c0_57, %c0_58] : memref<32x1024xbf16, #tpu.memory_space<vmem>>, vector<32x1024xbf16>
    %cst_59 = arith.constant dense<0.000000e+00> : vector<8x1024xf32>
    %89 = tpu.matmul %87, %88, %cst_59 {dimension_numbers = #tpu.dot_dimension_numbers<[1], [0], [0], [1], [0, 0, 1, 1], [], []>} : vector<8x32xbf16>, vector<32x1024xbf16>, vector<8x1024xf32> -> vector<8x1024xf32>
    %c0_60 = arith.constant 0 : index
    %c0_61 = arith.constant 0 : index
    %90 = vector.load %arg19[%c0_60, %c0_61] : memref<1x1024xf32, #tpu.memory_space<vmem>>, vector<1x1024xf32>
    %91 = vector.broadcast %90 : vector<1x1024xf32> to vector<8x1024xf32>
    %92 = arith.addf %89, %91 : vector<8x1024xf32>
    %cst_62 = arith.constant 0.000000e+00 : f32
    %93 = vector.broadcast %cst_62 : f32 to vector<8x1024xf32>
    %94 = arith.maximumf %92, %93 : vector<8x1024xf32>
    %95 = arith.truncf %94 : vector<8x1024xf32> to vector<8x1024xbf16>
    %c0_63 = arith.constant 0 : index
    %c0_64 = arith.constant 0 : index
    %96 = vector.load %arg25[%c0_63, %c0_64] : memref<1024x192xbf16, #tpu.memory_space<vmem>>, vector<1024x192xbf16>
    %cst_65 = arith.constant dense<0.000000e+00> : vector<8x192xf32>
    %97 = tpu.matmul %95, %96, %cst_65 {dimension_numbers = #tpu.dot_dimension_numbers<[1], [0], [0], [1], [0, 0, 1, 1], [], []>} : vector<8x1024xbf16>, vector<1024x192xbf16>, vector<8x192xf32> -> vector<8x192xf32>
    %c0_66 = arith.constant 0 : index
    %c0_67 = arith.constant 0 : index
    %98 = vector.load %arg24[%c0_66, %c0_67] : memref<1x192xf32, #tpu.memory_space<vmem>>, vector<1x192xf32>
    %99 = vector.broadcast %98 : vector<1x192xf32> to vector<8x192xf32>
    %100 = arith.addf %97, %99 : vector<8x192xf32>
    %cst_68 = arith.constant -1.000000e+01 : f32
    %cst_69 = arith.constant 1.000000e+01 : f32
    %101 = vector.broadcast %cst_68 : f32 to vector<8x1xf32>
    %102 = arith.maximumf %101, %32 : vector<8x1xf32>
    %103 = vector.broadcast %cst_69 : f32 to vector<8x1xf32>
    %104 = arith.minimumf %103, %102 : vector<8x1xf32>
    %105 = vector.extract_strided_slice %100 {offsets = [0, 0], sizes = [8, 64], strides = [1, 1]} : vector<8x192xf32> to vector<8x64xf32>
    %cst_70 = arith.constant 1.000000e+03 : f32
    %106 = math.log %cst_70 : f32
    %107 = vector.broadcast %106 : f32 to vector<8x64xf32>
    %108 = arith.minimumf %105, %107 : vector<8x64xf32>
    %109 = math.exp %108 : vector<8x64xf32>
    %cst_71 = arith.constant 1.000000e-03 : f32
    %cst_72 = arith.constant 1.000000e+03 : f32
    %110 = vector.broadcast %cst_71 : f32 to vector<8x64xf32>
    %111 = arith.maximumf %110, %109 : vector<8x64xf32>
    %112 = vector.broadcast %cst_72 : f32 to vector<8x64xf32>
    %113 = arith.minimumf %112, %111 : vector<8x64xf32>
    %114 = math.exp %104 : vector<8x1xf32>
    %115 = vector.broadcast %114 : vector<8x1xf32> to vector<8x64xf32>
    %116 = arith.mulf %113, %115 : vector<8x64xf32>
    %117 = vector.extract_strided_slice %100 {offsets = [0, 64], sizes = [8, 64], strides = [1, 1]} : vector<8x192xf32> to vector<8x64xf32>
    %cst_73 = arith.constant 0.000000e+00 : f32
    %118 = vector.broadcast %cst_73 : f32 to vector<8x64xf32>
    %119 = arith.maximumf %117, %118 : vector<8x64xf32>
    %120 = vector.broadcast %cst_73 : f32 to vector<8x64xf32>
    %121 = arith.subf %117, %120 : vector<8x64xf32>
    %122 = arith.cmpf one, %121, %121 : vector<8x64xf32>
    %123 = vector.broadcast %cst_73 : f32 to vector<8x64xf32>
    %124 = arith.addf %117, %123 : vector<8x64xf32>
    %125 = math.absf %121 : vector<8x64xf32>
    %cst_74 = arith.constant 0.000000e+00 : f32
    %126 = vector.broadcast %cst_74 : f32 to vector<8x64xf32>
    %127 = arith.subf %126, %125 : vector<8x64xf32>
    %128 = math.exp %127 : vector<8x64xf32>
    %129 = math.log1p %128 : vector<8x64xf32>
    %130 = arith.addf %119, %129 : vector<8x64xf32>
    %131 = arith.select %122, %124, %130 : vector<8x64xi1>, vector<8x64xf32>
    %cst_75 = arith.constant 1.000000e-03 : f32
    %cst_76 = arith.constant 1.000000e+03 : f32
    %132 = vector.broadcast %cst_75 : f32 to vector<8x64xf32>
    %133 = arith.maximumf %132, %131 : vector<8x64xf32>
    %134 = vector.broadcast %cst_76 : f32 to vector<8x64xf32>
    %135 = arith.minimumf %134, %133 : vector<8x64xf32>
    %136 = vector.extract_strided_slice %100 {offsets = [0, 128], sizes = [8, 64], strides = [1, 1]} : vector<8x192xf32> to vector<8x64xf32>
    %137 = arith.negf %136 : vector<8x64xf32>
    %138 = math.exp %137 : vector<8x64xf32>
    %cst_77 = arith.constant 1.000000e+00 : f32
    %139 = vector.broadcast %cst_77 : f32 to vector<8x64xf32>
    %140 = arith.addf %139, %138 : vector<8x64xf32>
    %141 = arith.divf %139, %140 : vector<8x64xf32>
    %c0_78 = arith.constant 0 : index
    %c0_79 = arith.constant 0 : index
    %142 = vector.load %arg26[%c0_78, %c0_79] : memref<8x16xf32, #tpu.memory_space<vmem>>, vector<8x16xf32>
    tpu.vector_store %arg26[%c0_78, %c0_79], %26 {strides = array<i32>} : memref<8x16xf32, #tpu.memory_space<vmem>>, vector<8x16xf32>,
    %c0_80 = arith.constant 0 : index
    %c0_81 = arith.constant 0 : index
    %143 = vector.load %arg27[%c0_80, %c0_81] : memref<8x16xf32, #tpu.memory_space<vmem>>, vector<8x16xf32>
    tpu.vector_store %arg27[%c0_80, %c0_81], %15 {strides = array<i32>} : memref<8x16xf32, #tpu.memory_space<vmem>>, vector<8x16xf32>,
    %cst_82 = arith.constant -1.000000e+01 : f32
    %cst_83 = arith.constant 1.000000e+01 : f32
    %144 = vector.broadcast %cst_82 : f32 to vector<8x16xf32>
    %145 = arith.maximumf %144, %16 : vector<8x16xf32>
    %146 = vector.broadcast %cst_83 : f32 to vector<8x16xf32>
    %147 = arith.minimumf %146, %145 : vector<8x16xf32>
    %c0_84 = arith.constant 0 : index
    %c0_85 = arith.constant 0 : index
    %148 = vector.load %arg28[%c0_84, %c0_85] : memref<8x16xf32, #tpu.memory_space<vmem>>, vector<8x16xf32>
    tpu.vector_store %arg28[%c0_84, %c0_85], %147 {strides = array<i32>} : memref<8x16xf32, #tpu.memory_space<vmem>>, vector<8x16xf32>,
    %c0_86 = arith.constant 0 : index
    %c0_87 = arith.constant 0 : index
    %149 = vector.load %arg29[%c0_86, %c0_87] : memref<8x16xf32, #tpu.memory_space<vmem>>, vector<8x16xf32>
    tpu.vector_store %arg29[%c0_86, %c0_87], %38 {strides = array<i32>} : memref<8x16xf32, #tpu.memory_space<vmem>>, vector<8x16xf32>,
    %c0_88 = arith.constant 0 : index
    %c0_89 = arith.constant 0 : index
    %150 = vector.load %arg30[%c0_88, %c0_89] : memref<8x16xf32, #tpu.memory_space<vmem>>, vector<8x16xf32>
    tpu.vector_store %arg30[%c0_88, %c0_89], %17 {strides = array<i32>} : memref<8x16xf32, #tpu.memory_space<vmem>>, vector<8x16xf32>,
    %c0_90 = arith.constant 0 : index
    %c0_91 = arith.constant 0 : index
    %151 = vector.load %arg31[%c0_90, %c0_91] : memref<8x16xf32, #tpu.memory_space<vmem>>, vector<8x16xf32>
    tpu.vector_store %arg31[%c0_90, %c0_91], %18 {strides = array<i32>} : memref<8x16xf32, #tpu.memory_space<vmem>>, vector<8x16xf32>,
    %c0_92 = arith.constant 0 : index
    %c0_93 = arith.constant 0 : index
    %152 = vector.load %arg32[%c0_92, %c0_93] : memref<8x4xf32, #tpu.memory_space<vmem>>, vector<8x4xf32>
    tpu.vector_store %arg32[%c0_92, %c0_93], %60 {strides = array<i32>} : memref<8x4xf32, #tpu.memory_space<vmem>>, vector<8x4xf32>,
    %c0_94 = arith.constant 0 : index
    %c0_95 = arith.constant 0 : index
    %153 = vector.load %arg33[%c0_94, %c0_95] : memref<8x4xf32, #tpu.memory_space<vmem>>, vector<8x4xf32>
    tpu.vector_store %arg33[%c0_94, %c0_95], %74 {strides = array<i32>} : memref<8x4xf32, #tpu.memory_space<vmem>>, vector<8x4xf32>,
    %c0_96 = arith.constant 0 : index
    %c0_97 = arith.constant 0 : index
    %154 = vector.load %arg34[%c0_96, %c0_97] : memref<8x64xf32, #tpu.memory_space<vmem>>, vector<8x64xf32>
    tpu.vector_store %arg34[%c0_96, %c0_97], %116 {strides = array<i32>} : memref<8x64xf32, #tpu.memory_space<vmem>>, vector<8x64xf32>,
    %c0_98 = arith.constant 0 : index
    %c0_99 = arith.constant 0 : index
    %155 = vector.load %arg35[%c0_98, %c0_99] : memref<8x64xf32, #tpu.memory_space<vmem>>, vector<8x64xf32>
    tpu.vector_store %arg35[%c0_98, %c0_99], %135 {strides = array<i32>} : memref<8x64xf32, #tpu.memory_space<vmem>>, vector<8x64xf32>,
    %c0_100 = arith.constant 0 : index
    %c0_101 = arith.constant 0 : index
    %156 = vector.load %arg36[%c0_100, %c0_101] : memref<8x64xf32, #tpu.memory_space<vmem>>, vector<8x64xf32>
    tpu.vector_store %arg36[%c0_100, %c0_101], %141 {strides = array<i32>} : memref<8x64xf32, #tpu.memory_space<vmem>>, vector<8x64xf32>,
    %c0_102 = arith.constant 0 : index
    %c0_103 = arith.constant 0 : index
    %157 = vector.load %arg37[%c0_102, %c0_103] : memref<8x1xf32, #tpu.memory_space<vmem>>, vector<8x1xf32>
    tpu.vector_store %arg37[%c0_102, %c0_103], %104 {strides = array<i32>} : memref<8x1xf32, #tpu.memory_space<vmem>>, vector<8x1xf32>,
    %c0_104 = arith.constant 0 : index
    %c0_105 = arith.constant 0 : index
    %158 = vector.load %arg38[%c0_104, %c0_105] : memref<8x1xf32, #tpu.memory_space<vmem>>, vector<8x1xf32>
    tpu.vector_store %arg38[%c0_104, %c0_105], %19 {strides = array<i32>} : memref<8x1xf32, #tpu.memory_space<vmem>>, vector<8x1xf32>,
    %c0_106 = arith.constant 0 : index
    %c0_107 = arith.constant 0 : index
    %159 = vector.load %arg39[%c0_106, %c0_107] : memref<8x1xf32, #tpu.memory_space<vmem>>, vector<8x1xf32>
    tpu.vector_store %arg39[%c0_106, %c0_107], %20 {strides = array<i32>} : memref<8x1xf32, #tpu.memory_space<vmem>>, vector<8x1xf32>,
    return
  }
  func.func @transform_0(%arg0: i32) -> (i32, i32) {
    %c0_i32 = arith.constant 0 : i32
    %c0_i32_0 = arith.constant 0 : i32
    return %arg0, %c0_i32 : i32, i32
  }
  func.func @transform_1(%arg0: i32) -> (i32, i32) {
    %c0_i32 = arith.constant 0 : i32
    %c0_i32_0 = arith.constant 0 : i32
    return %arg0, %c0_i32 : i32, i32
  }
  func.func @transform_2(%arg0: i32) -> (i32, i32) {
    %c0_i32 = arith.constant 0 : i32
    %c0_i32_0 = arith.constant 0 : i32
    return %arg0, %c0_i32 : i32, i32
  }
  func.func @transform_3(%arg0: i32) -> (i32, i32) {
    %c0_i32 = arith.constant 0 : i32
    %c0_i32_0 = arith.constant 0 : i32
    return %arg0, %c0_i32 : i32, i32
  }
  func.func @transform_4(%arg0: i32) -> (i32, i32) {
    %c0_i32 = arith.constant 0 : i32
    %c0_i32_0 = arith.constant 0 : i32
    %c0_i32_1 = arith.constant 0 : i32
    return %c0_i32, %c0_i32_0 : i32, i32
  }
  func.func @transform_5(%arg0: i32) -> (i32, i32) {
    %c0_i32 = arith.constant 0 : i32
    %c0_i32_0 = arith.constant 0 : i32
    %c0_i32_1 = arith.constant 0 : i32
    return %c0_i32, %c0_i32_0 : i32, i32
  }
  func.func @transform_6(%arg0: i32) -> (i32, i32) {
    %c0_i32 = arith.constant 0 : i32
    %c0_i32_0 = arith.constant 0 : i32
    %c0_i32_1 = arith.constant 0 : i32
    return %c0_i32, %c0_i32_0 : i32, i32
  }
  func.func @transform_7(%arg0: i32) -> (i32, i32) {
    %c0_i32 = arith.constant 0 : i32
    %c0_i32_0 = arith.constant 0 : i32
    %c0_i32_1 = arith.constant 0 : i32
    return %c0_i32, %c0_i32_0 : i32, i32
  }
  func.func @transform_8(%arg0: i32) -> (i32, i32) {
    %c0_i32 = arith.constant 0 : i32
    %c0_i32_0 = arith.constant 0 : i32
    %c0_i32_1 = arith.constant 0 : i32
    return %c0_i32, %c0_i32_0 : i32, i32
  }
  func.func @transform_9(%arg0: i32) -> (i32, i32) {
    %c0_i32 = arith.constant 0 : i32
    %c0_i32_0 = arith.constant 0 : i32
    %c0_i32_1 = arith.constant 0 : i32
    return %c0_i32, %c0_i32_0 : i32, i32
  }
  func.func @transform_10(%arg0: i32) -> (i32, i32) {
    %c0_i32 = arith.constant 0 : i32
    %c0_i32_0 = arith.constant 0 : i32
    %c0_i32_1 = arith.constant 0 : i32
    return %c0_i32, %c0_i32_0 : i32, i32
  }
  func.func @transform_11(%arg0: i32) -> (i32, i32) {
    %c0_i32 = arith.constant 0 : i32
    %c0_i32_0 = arith.constant 0 : i32
    %c0_i32_1 = arith.constant 0 : i32
    return %c0_i32, %c0_i32_0 : i32, i32
  }
  func.func @transform_12(%arg0: i32) -> (i32, i32) {
    %c0_i32 = arith.constant 0 : i32
    %c0_i32_0 = arith.constant 0 : i32
    %c0_i32_1 = arith.constant 0 : i32
    return %c0_i32, %c0_i32_0 : i32, i32
  }
  func.func @transform_13(%arg0: i32) -> (i32, i32) {
    %c0_i32 = arith.constant 0 : i32
    %c0_i32_0 = arith.constant 0 : i32
    %c0_i32_1 = arith.constant 0 : i32
    return %c0_i32, %c0_i32_0 : i32, i32
  }
  func.func @transform_14(%arg0: i32) -> (i32, i32) {
    %c0_i32 = arith.constant 0 : i32
    %c0_i32_0 = arith.constant 0 : i32
    %c0_i32_1 = arith.constant 0 : i32
    return %c0_i32, %c0_i32_0 : i32, i32
  }
  func.func @transform_15(%arg0: i32) -> (i32, i32) {
    %c0_i32 = arith.constant 0 : i32
    %c0_i32_0 = arith.constant 0 : i32
    %c0_i32_1 = arith.constant 0 : i32
    return %c0_i32, %c0_i32_0 : i32, i32
  }
  func.func @transform_16(%arg0: i32) -> (i32, i32) {
    %c0_i32 = arith.constant 0 : i32
    %c0_i32_0 = arith.constant 0 : i32
    %c0_i32_1 = arith.constant 0 : i32
    return %c0_i32, %c0_i32_0 : i32, i32
  }
  func.func @transform_17(%arg0: i32) -> (i32, i32) {
    %c0_i32 = arith.constant 0 : i32
    %c0_i32_0 = arith.constant 0 : i32
    %c0_i32_1 = arith.constant 0 : i32
    return %c0_i32, %c0_i32_0 : i32, i32
  }
  func.func @transform_18(%arg0: i32) -> (i32, i32) {
    %c0_i32 = arith.constant 0 : i32
    %c0_i32_0 = arith.constant 0 : i32
    %c0_i32_1 = arith.constant 0 : i32
    return %c0_i32, %c0_i32_0 : i32, i32
  }
  func.func @transform_19(%arg0: i32) -> (i32, i32) {
    %c0_i32 = arith.constant 0 : i32
    %c0_i32_0 = arith.constant 0 : i32
    %c0_i32_1 = arith.constant 0 : i32
    return %c0_i32, %c0_i32_0 : i32, i32
  }
  func.func @transform_20(%arg0: i32) -> (i32, i32) {
    %c0_i32 = arith.constant 0 : i32
    %c0_i32_0 = arith.constant 0 : i32
    %c0_i32_1 = arith.constant 0 : i32
    return %c0_i32, %c0_i32_0 : i32, i32
  }
  func.func @transform_21(%arg0: i32) -> (i32, i32) {
    %c0_i32 = arith.constant 0 : i32
    %c0_i32_0 = arith.constant 0 : i32
    %c0_i32_1 = arith.constant 0 : i32
    return %c0_i32, %c0_i32_0 : i32, i32
  }
  func.func @transform_22(%arg0: i32) -> (i32, i32) {
    %c0_i32 = arith.constant 0 : i32
    %c0_i32_0 = arith.constant 0 : i32
    %c0_i32_1 = arith.constant 0 : i32
    return %c0_i32, %c0_i32_0 : i32, i32
  }
  func.func @transform_23(%arg0: i32) -> (i32, i32) {
    %c0_i32 = arith.constant 0 : i32
    %c0_i32_0 = arith.constant 0 : i32
    %c0_i32_1 = arith.constant 0 : i32
    return %c0_i32, %c0_i32_0 : i32, i32
  }
  func.func @transform_24(%arg0: i32) -> (i32, i32) {
    %c0_i32 = arith.constant 0 : i32
    %c0_i32_0 = arith.constant 0 : i32
    %c0_i32_1 = arith.constant 0 : i32
    return %c0_i32, %c0_i32_0 : i32, i32
  }
  func.func @transform_25(%arg0: i32) -> (i32, i32) {
    %c0_i32 = arith.constant 0 : i32
    %c0_i32_0 = arith.constant 0 : i32
    return %arg0, %c0_i32 : i32, i32
  }
  func.func @transform_26(%arg0: i32) -> (i32, i32) {
    %c0_i32 = arith.constant 0 : i32
    %c0_i32_0 = arith.constant 0 : i32
    return %arg0, %c0_i32 : i32, i32
  }
  func.func @transform_27(%arg0: i32) -> (i32, i32) {
    %c0_i32 = arith.constant 0 : i32
    %c0_i32_0 = arith.constant 0 : i32
    return %arg0, %c0_i32 : i32, i32
  }
  func.func @transform_28(%arg0: i32) -> (i32, i32) {
    %c0_i32 = arith.constant 0 : i32
    %c0_i32_0 = arith.constant 0 : i32
    return %arg0, %c0_i32 : i32, i32
  }
  func.func @transform_29(%arg0: i32) -> (i32, i32) {
    %c0_i32 = arith.constant 0 : i32
    %c0_i32_0 = arith.constant 0 : i32
    return %arg0, %c0_i32 : i32, i32
  }
  func.func @transform_30(%arg0: i32) -> (i32, i32) {
    %c0_i32 = arith.constant 0 : i32
    %c0_i32_0 = arith.constant 0 : i32
    return %arg0, %c0_i32 : i32, i32
  }
  func.func @transform_31(%arg0: i32) -> (i32, i32) {
    %c0_i32 = arith.constant 0 : i32
    %c0_i32_0 = arith.constant 0 : i32
    return %arg0, %c0_i32 : i32, i32
  }
  func.func @transform_32(%arg0: i32) -> (i32, i32) {
    %c0_i32 = arith.constant 0 : i32
    %c0_i32_0 = arith.constant 0 : i32
    return %arg0, %c0_i32 : i32, i32
  }
  func.func @transform_33(%arg0: i32) -> (i32, i32) {
    %c0_i32 = arith.constant 0 : i32
    %c0_i32_0 = arith.constant 0 : i32
    return %arg0, %c0_i32 : i32, i32
  }
  func.func @transform_34(%arg0: i32) -> (i32, i32) {
    %c0_i32 = arith.constant 0 : i32
    %c0_i32_0 = arith.constant 0 : i32
    return %arg0, %c0_i32 : i32, i32
  }
  func.func @transform_35(%arg0: i32) -> (i32, i32) {
    %c0_i32 = arith.constant 0 : i32
    %c0_i32_0 = arith.constant 0 : i32
    return %arg0, %c0_i32 : i32, i32
  }
  func.func @transform_36(%arg0: i32) -> (i32, i32) {
    %c0_i32 = arith.constant 0 : i32
    %c0_i32_0 = arith.constant 0 : i32
    return %arg0, %c0_i32 : i32, i32
  }
  func.func @transform_37(%arg0: i32) -> (i32, i32) {
    %c0_i32 = arith.constant 0 : i32
    %c0_i32_0 = arith.constant 0 : i32
    return %arg0, %c0_i32 : i32, i32
  }
  func.func @transform_38(%arg0: i32) -> (i32, i32) {
    %c0_i32 = arith.constant 0 : i32
    %c0_i32_0 = arith.constant 0 : i32
    return %arg0, %c0_i32 : i32, i32
  }
}

</mosaic_0001>

<bundles_post_ra>
// kernel: gene_vae_forward.1
= control target key start
LH: loop header
LB: loop body
LE: loop exit
PB: predicated region body
PF: predicated region fallthrough
CT: control target
= control target key end

     0   :  { %s3102_s6 = smov 1   ;;  %s3103_s10 = smov 2   ;;  %s3713_s0 = inlined_call_operand.smem [shape: u32[39], index: -1, kind: input, shape index: {}] }
   0x1   :  { %s3170_s5 = sld [smem:[%s3713_s0]]   ;;  %s3104_s14 = smov 3  }
   0x2   :  { %s3175_s9 = sld [smem:[%s3713_s0 + %s3102_s6]]   ;;  %s3105_s18 = smov 4  }
   0x3   :  { %s3180_s13 = sld [smem:[%s3713_s0 + %s3103_s10]]   ;;  %s3106_s22 = smov 5  }
   0x4   :  { %s3185_s17 = sld [smem:[%s3713_s0 + %s3104_s14]]   ;;  %s3107_s26 = smov 6  }
   0x5   :  { %s3190_s21 = sld [smem:[%s3713_s0 + %s3105_s18]]   ;;  %s3108_s30 = smov 7  }
   0x6   :  { %s3195_s25 = sld [smem:[%s3713_s0 + %s3106_s22]]   ;;  %s3109_s4 = smov 8  }
   0x7   :  { %s3200_s29 = sld [smem:[%s3713_s0 + %s3107_s26]]   ;;  %s3110_s10 = smov 9  }
   0x8   :  { %s3205_s3 = sld [smem:[%s3713_s0 + %s3108_s30]]   ;;  %s3111_s15 = smov 10  }
   0x9   :  { %s3210_s8 = sld [smem:[%s3713_s0 + %s3109_s4]]   ;;  %s3112_s20 = smov 11  }
   0xa   :  { %s3215_s14 = sld [smem:[%s3713_s0 + %s3110_s10]]   ;;  %s3113_s26 = smov 12  }
   0xb   :  { %s3220_s19 = sld [smem:[%s3713_s0 + %s3111_s15]]   ;;  %s3114_s1 = smov 13  }
   0xc   :  { %3724 = sst [smem:[#allocation21_spill]] %s3195_s25  ;;  %s3115_s7 = smov 14  }
   0xd   :  { %3725 = sst [smem:[#allocation22_spill]] %s3200_s29  ;;  %s3116_s15 = smov 15  }
   0xe   :  { %3726 = sst [smem:[#allocation23_spill]] %s3205_s3  ;;  %s3117_s22 = smov 16  }
   0xf   :  { %s3225_s24 = sld [smem:[%s3713_s0 + %s3112_s20]]   ;;  %s3118_s28 = smov 17  }
  0x10   :  { %s3230_s30 = sld [smem:[%s3713_s0 + %s3113_s26]]  }
  0x11   :  { %s3235_s6 = sld [smem:[%s3713_s0 + %s3114_s1]]  }
  0x12   :  { %s3240_s12 = sld [smem:[%s3713_s0 + %s3115_s7]]   ;;  %s3119_s7 = smov 18  }
  0x13   :  { %s3245_s20 = sld [smem:[%s3713_s0 + %s3116_s15]]   ;;  %s3120_s15 = smov 19  }
  0x14   :  { %s3250_s27 = sld [smem:[%s3713_s0 + %s3117_s22]]   ;;  %s3121_s22 = smov 20  }
  0x15   :  { %3727 = sst [smem:[#allocation24_spill]] %s3225_s24 }
  0x16   :  { %s3255_s4 = sld [smem:[%s3713_s0 + %s3118_s28]]   ;;  %s3122_s28 = smov 21  }
  0x17   :  { %3728 = sst [smem:[#allocation25_spill]] %s3235_s6 }
  0x18   :  { %3729 = sst [smem:[#allocation26_spill]] %s3240_s12 }
  0x19   :  { %s3260_s12 = sld [smem:[%s3713_s0 + %s3119_s7]]   ;;  %s3123_s7 = smov 22  }
  0x1a   :  { %3730 = sst [smem:[#allocation27_spill]] %s3250_s27 }
  0x1b   :  { %s3265_s3 = sld [smem:[%s3713_s0 + %s3120_s15]]   ;;  %s3124_s15 = smov 23  }
  0x1c   :  { %3731 = sst [smem:[#allocation28_spill]] %s3255_s4 }
  0x1d   :  { %s3270_s6 = sld [smem:[%s3713_s0 + %s3121_s22]]   ;;  %s3125_s22 = smov 24  }
  0x1e   :  { %s3275_s4 = sld [smem:[%s3713_s0 + %s3122_s28]]   ;;  %s3126_s28 = smov 25  }
  0x1f   :  { %3732 = sst [smem:[#allocation29_spill]] %s3260_s12 }
  0x20   :  { %s3280_s12 = sld [smem:[%s3713_s0 + %s3123_s7]]   ;;  %s3127_s7 = smov 26  }
  0x21   :  { %s3285_s27 = sld [smem:[%s3713_s0 + %s3124_s15]]   ;;  %s3128_s15 = smov 27  }
  0x22   :  { %s3290_s25 = sld [smem:[%s3713_s0 + %s3125_s22]]   ;;  %s3129_s22 = smov 28  }
  0x23   :  { %s3295_s29 = sld [smem:[%s3713_s0 + %s3126_s28]]   ;;  %s3130_s28 = smov 29  }
  0x24   :  { %s3300_s24 = sld [smem:[%s3713_s0 + %s3127_s7]]   ;;  %s3131_s7 = smov 30  }
  0x27   :  { %3733 = sst [smem:[#allocation30_spill]] %s3285_s27 }
  0x28   :  { %3734 = sst [smem:[#allocation31_spill]] %s3290_s25 }
  0x29   :  { %3735 = sst [smem:[#allocation32_spill]] %s3295_s29 }
  0x2a   :  { %3736 = sst [smem:[#allocation33_spill]] %s3300_s24 }
  0x2b   :  { %s3305_s27 = sld [smem:[%s3713_s0 + %s3128_s15]]   ;;  %s3132_s15 = smov 31  }
  0x2c   :  { %s3310_s25 = sld [smem:[%s3713_s0 + %s3129_s22]]   ;;  %s3133_s22 = smov 32  }
  0x2d   :  { %s3315_s29 = sld [smem:[%s3713_s0 + %s3130_s28]]   ;;  %s3134_s28 = smov 33  }
  0x2e   :  { %s3320_s24 = sld [smem:[%s3713_s0 + %s3131_s7]]   ;;  %s3135_s7 = smov 34  }
  0x31   :  { %3737 = sst [smem:[#allocation34_spill]] %s3305_s27 }
  0x32   :  { %3738 = sst [smem:[#allocation35_spill]] %s3310_s25 }
  0x33   :  { %3739 = sst [smem:[#allocation36_spill]] %s3315_s29 }
  0x34   :  { %3740 = sst [smem:[#allocation37_spill]] %s3320_s24 }
  0x35   :  { %s3325_s27 = sld [smem:[%s3713_s0 + %s3132_s15]]   ;;  %s3136_s15 = smov 35  }
  0x36   :  { %s3330_s25 = sld [smem:[%s3713_s0 + %s3133_s22]]   ;;  %s3137_s22 = smov 36  }
  0x37   :  { %s3335_s29 = sld [smem:[%s3713_s0 + %s3134_s28]]   ;;  %s3138_s28 = smov 37  }
  0x38   :  { %s3340_s24 = sld [smem:[%s3713_s0 + %s3135_s7]]   ;;  %s3139_s7 = smov 38  }
  0x3b   :  { %3741 = sst [smem:[#allocation38_spill]] %s3325_s27 }
  0x3c   :  { %3742 = sst [smem:[#allocation39_spill]] %s3330_s25 }
  0x3d   :  { %3743 = sst [smem:[#allocation40_spill]] %s3335_s29 }
  0x3e   :  { %3744 = sst [smem:[#allocation41_spill]] %s3340_s24 }
  0x3f   :  { %s3345_s27 = sld [smem:[%s3713_s0 + %s3136_s15]]  }
  0x40   :  { %s3350_s25 = sld [smem:[%s3713_s0 + %s3137_s22]]  }
  0x41   :  { %s3355_s29 = sld [smem:[%s3713_s0 + %s3138_s28]]  }
  0x42   :  { %s3360_s24 = sld [smem:[%s3713_s0 + %s3139_s7]]  }
  0x43   :  { %83 = vsyncpa [#allocation3], 0 }
  0x44   :  { %84 = vsyncpa [#allocation5], 0 }
  0x45   :  { %85 = vsyncpa [#allocation8], 0 }
  0x46   :  { %86 = vsyncpa [#allocation11], 0  ;;  %v2670_v0 = vld [vmem:[%s3270_s6] sm:$0xff]   ;;  %v3140_v1 = vmov 0.0   ;;  %v2671_v2 = vld [vmem:[%s3270_s6 + $0x8] sm:$0xff]   ;;  %vm3141_vm0 = vmmov 0  }
  0x47   :  { %2524 = vmatprep.subr.bf16.mxu0 %v3140_v1  ;;  %2536 = vmatprep.subr.bf16.mxu1 %v3140_v1  ;;  %v2674_v3 = vld [vmem:[%s3280_s12] sm:$0xff]   ;;  %v2672_v4 = vld [vmem:[%s3270_s6 + $0x10] sm:$0xff]   ;;  %v2675_v5 = vld [vmem:[%s3280_s12 + $0x8] sm:$0xff]   ;;  %vm180_vm1 = vcmask 523264  }
  0x48   :  { %2525 = vmatpush3.bf16.msra.mxu0 %v2670_v0  ;;  %2532 = vmatprep.mubr.msk.bf16.mxu0 %vm3141_vm0, %v3140_v1  ;;  %v2673_v6 = vld [vmem:[%s3270_s6 + $0x18] sm:$0xff]   ;;  %v139_v7 = vld [vmem:[%s3170_s5] sm:$0xff]  ;;  %v2676_v8 = vld [vmem:[%s3280_s12 + $0x10] sm:$0xff]  }
  0x49   :  { %2526 = vmatprep.subr.bf16.mxu0 %v3140_v1  ;;  %2548 = vmatprep.mubr.msk.bf16.mxu1 %vm3141_vm0, %v3140_v1  ;;  %v140_v9 = vpack.c.bf16 %v139_v7, %v139_v7  ;;  %v2677_v10 = vld [vmem:[%s3280_s12 + $0x18] sm:$0xff]  }
  0x4a   :  { %2537 = vmatpush3.bf16.msra.mxu1 %v2674_v3 }
  0x4b   :  { %2538 = vmatprep.subr.bf16.mxu1 %v3140_v1 }
  0x4c   :  { %2527 = vmatpush3.bf16.msra.mxu0 %v2671_v2 }
  0x4d   :  { %2528 = vmatprep.subr.bf16.mxu0 %v3140_v1 }
  0x4e   :  { %2539 = vmatpush3.bf16.msra.mxu1 %v2675_v5 }
  0x4f   :  { %2540 = vmatprep.subr.bf16.mxu1 %v3140_v1 }
  0x50   :  { %2529 = vmatpush3.bf16.msra.mxu0 %v2672_v4 }
  0x51   :  { %2530 = vmatprep.subr.bf16.mxu0 %v3140_v1 }
  0x52   :  { %2541 = vmatpush3.bf16.msra.mxu1 %v2676_v8 }
  0x53   :  { %2542 = vmatprep.subr.bf16.mxu1 %v3140_v1 }
  0x54   :  { %2531 = vmatpush3.bf16.msra.mxu0 %v2673_v6 }
  0x55   :  { %2552 = vmatprep.subr.bf16.mxu0 %v3140_v1 }
  0x56   :  { %2543 = vmatpush3.bf16.msra.mxu1 %v2677_v10 }
  0x57   :  { %2533 = vmatmul.mubr.msk.bf16.vlgmr.msra.gmra.mrb[0].mxu0 %vm180_vm1, %v140_v9  ;;  %2544 = vmatprep.subr.bf16.mxu1 %v3140_v1 }
  0x58   :  { %2554 = vmatprep.mubr.msk.bf16.mxu0 %vm3141_vm0, %v3140_v1 }
  0x59   :  { %87 = vsyncpa [#allocation14], 0  ;;  %v2678_v11 = vld [vmem:[%s3280_s12 + $0x20] sm:$0xff]   ;;  %v2679_v12 = vld [vmem:[%s3280_s12 + $0x28] sm:$0xff]   ;;  %s3142_s0 = smov 48   ;;  %s3143_s5 = smov 16  }
  0x5a   :  { %2545 = vmatpush3.bf16.msra.mxu1 %v2678_v11  ;;  %v350_v13 = vld [vmem:[%s3185_s17] sm:$0xff]  ;;  %vm281_vm2 = vcmask 785408   ;;  %vm377_vm3 = vcmask 130048   ;;  %s3145_s17 = smov 65   ;;  %v3148_v45 = vmov 64   ;;  %v2682_v49 = vld [vmem:[%s3220_s19 + $0x8] sm:$0xff]  }
  0x5b   :  { %2546 = vmatprep.subr.bf16.mxu1 %v3140_v1  ;;  %v328_v14 = vld [vmem:[%s3175_s9] sm:$0xff]  ;;  %352 = vrot.lane.b32.xlu1 %v350_v13, %s3142_s0  ;;  %s3144_s9 = smov 112   ;;  %s3151_s6 = smov 63   ;;  %vm446_vm4 = vcmask 261120   ;;  %vm2121_vm5 = vcmask 7168   ;;  %vm2107_vm6 = vcmask 31744  }
  0x5c   :  { %330 = vrot.lane.b32.xlu0 %v328_v14, %s3143_s5  ;;  %v2311_v15 = vld [vmem:[%s3265_s3] ss:$0 sm:$0xff]  ;;  %s3146_s3 = smov 80   ;;  %2668 = vset.pattern.permute.xlu1 %v3148_v45  ;;  %s3748_s12 = sld [smem:[#allocation27_spill]] }
  0x5d   :  { %v2680_v23 = vld [vmem:[%s3210_s8] sm:$0xff]   ;;  %s3147_s8 = smov 96   ;;  %2669 = vset.pattern.permute.xlu0 %v3148_v45  ;;  %s3753_s15 = sld [smem:[#allocation39_spill]] }
  0x5e   :  { %2547 = vmatpush3.bf16.msra.mxu1 %v2679_v12  ;;  %2553 = vmatpush3.bf16.msra.mxu0 %v2680_v23  ;;  %v2317_v24 = vld [vmem:[%s3275_s4] ss:$0 sm:$0xff]  ;;  %s3752_s4 = sld [smem:[#allocation23_spill]]  ;;  %s3754_s16 = sld [smem:[#allocation26_spill]] }
  0x5f   :  { %2566 = vmatprep.subr.bf16.mxu1 %v3140_v1  ;;  %2558 = vmatprep.subr.bf16.mxu0 %v3140_v1  ;;  %v339_v37 = vld [vmem:[%s3180_s13] sm:$0xff]  ;;  %s3149_s13 = smov 127   ;;  %s3755_s18 = sld [smem:[#allocation31_spill]] }
  0x60   :  { %v2681_v48 = vld [vmem:[%s3220_s19] sm:$0xff]   ;;  %s3150_s19 = smov 64   ;;  %s3756_s22 = sld [smem:[#allocation29_spill]] }
  0x61   :  { %v2685_v59 = vld [vmem:[%s3230_s30] sm:$0xff]   ;;  %s3745_s30 = sld [smem:[#allocation24_spill]]  ;;  %s3757_s23 = sld [smem:[#allocation30_spill]] }
  0x62   :  { %v2325_v60 = vld [vmem:[%s3215_s14] ss:$0 sm:$0xff]  ;;  %s3747_s14 = sld [smem:[#allocation21_spill]]  ;;  %s3153_s26 = smov [#allocation4]  }
  0x63   :  { %v2683_v4 = vld [vmem:[%s3190_s21] sm:$0xff]   ;;  %s3746_s21 = sld [smem:[#allocation22_spill]]  ;;  %s2147_s28 = sshll.u32 %s3153_s26, 4  ;;  %s2148_s28 = int_to_ptr.vmem [resolvable:$true] %s2147_s28 }
  0x64   :  { %v2684_v6 = vld [vmem:[%s3245_s20] sm:$0xff]   ;;  %s3751_s20 = sld [smem:[#allocation38_spill]]  ;;  %s3154_s1 = smov [#allocation7]  }
  0x65   :  { %s2167_s2 = sshll.u32 %s3154_s1, 4  ;;  %s2894_s7 = scalar_lea.vmem %s2148_s28, 128  ;;  %s3660_s2 = int_to_ptr.vmem [resolvable:$true] %s2167_s2 }
  0x66   :  { %p2895_p0 = scmp.ne.s32.totalorder %s2148_s28, %s2894_s7  ;;  %p2899_p1 = scmp.lt.s32.totalorder %s2148_s28, %s2148_s28 }
  0x67   :  { %v2328_v11 = vld [vmem:[%s3745_s30] ss:$0 sm:$0xff]  ;;  %p2900_p2 = scmp.lt.s32.totalorder %s2894_s7, %s2894_s7 }
  0x69   :  { %p2901_p3 = por %p2900_p2, %p2899_p1 }
  0x6b   :  { %p2902_p4 = pnand %p2901_p3, %p2895_p0 }
  0xcd   :  { %v353_v32 = vpop.permute.xlu1 %352 }
  0xce   :  { %v331_v33 = vpop.permute.xlu0 %330 }
 0x12a   :  { %v218_v16 = vpop.f32.mrb[0].mxu0 }
 0x12b   :  { %v219_v17 = vadd.f32 %v2311_v15, %v218_v16  ;;  %v2534_v18 = vpop.f32.mrb[1].mxu0 }
 0x12c   :  { %v221_v19 = vpop.f32.mrb[2].mxu0  ;;  %v2686_v18 = vld [vmem:[%s3746_s21] sm:$0xff]  }
 0x12d   :  { %v224_v20 = vmax.f32 %v219_v17, 0.0  ;;  %v2535_v21 = vpop.f32.mrb[3].mxu0 }
 0x12f   :  { %v225_v22 = vpack.c.bf16 %v224_v20, %v224_v20  ;;  %v2335_v20 = vld [vmem:[%s3747_s14] ss:$0 sm:$0xff] }
 0x131   :  { %2549 = vmatmul.mubr.msk.bf16.vlgmr.msra.gmra.mrb[0].mxu1 %vm281_vm2, %v225_v22 }
 0x132   :  { %2568 = vmatprep.mubr.msk.bf16.mxu1 %vm3141_vm0, %v3140_v1  ;;  %2567 = vmatpush3.bf16.msra.mxu1 %v2685_v59 }
 0x133   :  { %2578 = vmatprep.subr.bf16.mxu1 %v3140_v1 }
 0x204   :  { %v319_v25 = vpop.f32.mrb[0].mxu1 }
 0x205   :  { %v3400_v26 = vadd.f32 %v2317_v24, %v319_v25  ;;  %v2550_v27 = vpop.f32.mrb[1].mxu1 }
 0x206   :  { %v322_v28 = vpop.f32.mrb[2].mxu1 }
 0x207   :  { %v2551_v29 = vpop.f32.mrb[3].mxu1  ;;  %v325_v30 = vmul.f32 0.5, %v3400_v26  ;;  %2085 = vst.msk [vmem:[#allocation4] sm:$0xff] %vm377_vm3, %v3400_v26  ;;  %v2496_v58 = vclamps-f32 %v3400_v26, 10.0  ;;  %v2687_v28 = vld [vmem:[%s3748_s12] sm:$0xff]  }
 0x209   :  { %v326_v31 = vmul.f32 1.442695, %v325_v30 }
 0x20b   :  { %2880 = vpow2.f32 %v326_v31 }
 0x215   :  { %v2881_v34 = vpop.eup %2880 }
 0x216   :  { %v355_v35 = vmul.f32 %v2881_v34, %v353_v32  ;;  %v333_v36 = vmul.f32 %v2881_v34, %v331_v33 }
 0x218   :  { %357 = vrot.lane.b32.xlu1 %v355_v35, %s3144_s9  ;;  %335 = vrot.lane.b32.xlu0 %v333_v36, %s3144_s9 }
 0x21c   :  { %341 = vrot.lane.b32.xlu1 %v339_v37, %s3145_s17 }
 0x220   :  { %2103 = vrot.lane.b32.xlu1 %v3400_v26, %s3146_s3 }
 0x28a   :  { %v358_v38 = vpop.permute.xlu1 %357  ;;  %v336_v39 = vpop.permute.xlu0 %335 }
 0x28b   :  { %v360_v40 = vadd.f32 %v358_v38, %v3400_v26  ;;  %v338_v41 = vadd.f32 %v336_v39, %v3400_v26 }
 0x28d   :  { %v550_v42 = vpack.c.bf16 %v360_v40, %v360_v40  ;;  %v3411_v43 = vpack.c.bf16 %v338_v41, %v338_v41  ;;  %2084 = vst.msk [vmem:[#allocation2] sm:$0xff] %vm377_vm3, %v338_v41 }
 0x28e   :  { %v342_v44 = vpop.permute.xlu1 %341 }
 0x28f   :  { %561 = vrot.lane.b32.xlu0 %v550_v42, %s3147_s8  ;;  %2555 = vmatmul.mubr.msk.bf16.vlgmr.msra.gmra.mrb[4].mxu0 %vm377_vm3, %v3411_v43  ;;  %v344_v46 = vmul.f32 %v2881_v34, %v342_v44 }
 0x290   :  { %2562 = vmatprep.mubr.msk.bf16.mxu0 %vm3141_vm0, %v3140_v1  ;;  %2559 = vmatpush3.bf16.msra.mxu0 %v2681_v48 }
 0x291   :  { %2560 = vmatprep.subr.bf16.mxu0 %v3140_v1 }
 0x292   :  { %v2104_v47 = vpop.permute.xlu1 %2103 }
 0x293   :  { %2106 = vst.msk [vmem:[#allocation10] sm:$0xff] %vm377_vm3, %v2104_v47  ;;  %346 = vrot.lane.b32.xlu0 %v344_v46, %s3149_s13 }
 0x294   :  { %2561 = vmatpush3.bf16.msra.mxu0 %v2682_v49 }
 0x295   :  { %2572 = vmatprep.subr.bf16.mxu0 %v3140_v1 }
 0x297   :  { %2094 = vrot.lane.b32.xlu0 %v360_v40, %s3147_s8 }
 0x29b   :  { %2099 = vrot.lane.b32.xlu0 %v3400_v26, %s3147_s8 }
 0x301   :  { %v562_v50 = vpop.permute.xlu0 %561 }
 0x305   :  { %v347_v51 = vpop.permute.xlu0 %346 }
 0x306   :  { %v349_v52 = vadd.f32 %v347_v51, %v3400_v26 }
 0x308   :  { %v2494_v53 = vclamps-f32 %v349_v52, 10.0 }
 0x309   :  { %v2095_v54 = vpop.permute.xlu0 %2094 }
 0x30a   :  { %v2050_v55 = vmul.f32 1.442695, %v2494_v53  ;;  %2097 = vst.msk [vmem:[#allocation7] sm:$0xff] %vm377_vm3, %v2095_v54 }
 0x30c   :  { %2882 = vpow2.f32 %v2050_v55  ;;  %v3152_v55 = vmov 0  }
 0x30d   :  { %v2100_v56 = vpop.permute.xlu0 %2099 }
 0x30e   :  { %2102 = vst.msk [vmem:[#allocation9] sm:$0xff] %vm377_vm3, %v2100_v56 }
 0x316   :  { %v2883_v57 = vpop.eup %2882 }
 0x317   :  { %2054 = vperm.xlu1 %2668, %v2883_v57  }
 0x31b   :  { %2089 = vrot.lane.b32.xlu1 %v2496_v58, %s3144_s9 }
 0x31f   :  { %2118 = vrot.lane.b32.xlu1 %v2494_v53, %s3150_s19 }
 0x323   :  { %2127 = vrot.lane.b32.xlu1 %v3400_v26, %s3151_s6 }
 0x362   :  { %v415_v61 = vpop.f32.mrb[4].mxu0 }
 0x363   :  { %v416_v62 = vadd.f32 %v2325_v60, %v415_v61  ;;  %v2556_v63 = vpop.f32.mrb[5].mxu0 }
 0x364   :  { %v418_v0 = vpop.f32.mrb[6].mxu0 }
 0x365   :  { %v421_v2 = vmax.f32 %v416_v62, 0.0  ;;  %v2557_v3 = vpop.f32.mrb[7].mxu0  ;;  %v2338_v0 = vld [vmem:[%s3752_s4] ss:$0 sm:$0xff] }
 0x367   :  { %v422_v5 = vpack.c.bf16 %v421_v2, %v421_v2 }
 0x369   :  { %2563 = vmatmul.mubr.msk.bf16.vlgmr.msra.gmra.mrb[8].mxu0 %vm446_vm4, %v422_v5 }
 0x36a   :  { %2573 = vmatpush3.bf16.msra.mxu0 %v2683_v4  ;;  %2574 = vmatprep.mubr.msk.bf16.mxu0 %vm3141_vm0, %v3140_v1 }
 0x36b   :  { %2584 = vmatprep.subr.bf16.mxu0 %v3140_v1 }
 0x371   :  { %2575 = vmatmul.mubr.msk.bf16.vlgmr.msra.gmra.mrb[12].mxu0 %vm377_vm3, %v562_v50 }
 0x372   :  { %2585 = vmatpush3.bf16.msra.mxu0 %v2684_v6  ;;  %2586 = vmatprep.mubr.msk.bf16.mxu0 %vm3141_vm0, %v3140_v1 }
 0x379   :  { %2587 = vmatmul.mubr.msk.bf16.vlgmr.msra.gmra.mrb[16].mxu0 %vm377_vm3, %v562_v50 }
 0x37a   :  { %951 = vmatprep.mubr.bf16.mxu0 %v3152_v55 }
 0x396   :  { %v3444_v7 = vpop.permute.xlu1 %2054 }
 0x39a   :  { %v2090_v8 = vpop.permute.xlu1 %2089 }
 0x39b   :  { %2092 = vst.msk [vmem:[#allocation6] sm:$0xff] %vm377_vm3, %v2090_v8 }
 0x39e   :  { %v2119_v9 = vpop.permute.xlu1 %2118 }
 0x39f   :  { %2122 = vst.msk [vmem:[%s3350_s25] sm:$0xff] %vm2121_vm5, %v2119_v9  ;;  %s3749_s25 = sld [smem:[#allocation28_spill]]  ;;  %v2345_v9 = vld [vmem:[%s3754_s16] ss:$0 sm:$0xff] }
 0x3a2   :  { %v2128_v10 = vpop.permute.xlu1 %2127 }
 0x3a3   :  { %2130 = vst.msk [vmem:[%s3360_s24] sm:$0xff] %vm2121_vm5, %v2128_v10  ;;  %s3750_s24 = sld [smem:[#allocation25_spill]] }
 0x3a5   :  { %v778_v34 = vld [vmem:[%s3749_s25] sm:$0xff]  ;;  %v779_v36 = vld [vmem:[%s3749_s25 + $0x8] sm:$0xff]  ;;  %v780_v49 = vld [vmem:[%s3749_s25 + $0x10] sm:$0xff] }
 0x3a6   :  { %v782_v35 = vld [vmem:[%s3749_s25 + $0x20] sm:$0xff]  ;;  %v783_v38 = vld [vmem:[%s3749_s25 + $0x28] sm:$0xff]  ;;  %v784_v50 = vld [vmem:[%s3749_s25 + $0x30] sm:$0xff] }
 0x3a7   :  { %v2347_v37 = vcombine.high %v778_v34, %v782_v35  ;;  %v2346_v39 = vcombine.low %v778_v34, %v782_v35  ;;  %v2348_v40 = vcombine.low %v779_v36, %v783_v38  ;;  %v2349_v41 = vcombine.high %v779_v36, %v783_v38  ;;  %v790_v42 = vld [vmem:[%s3749_s25 + $0x60] sm:$0xff]  ;;  %v787_v44 = vld [vmem:[%s3749_s25 + $0x48] sm:$0xff]  ;;  %v781_v51 = vld [vmem:[%s3749_s25 + $0x18] sm:$0xff] }
 0x3a8   :  { %v791_v45 = vld [vmem:[%s3749_s25 + $0x68] sm:$0xff]  ;;  %v2350_v52 = vcombine.low %v780_v49, %v784_v50  ;;  %v2351_v53 = vcombine.high %v780_v49, %v784_v50  ;;  %v785_v54 = vld [vmem:[%s3749_s25 + $0x38] sm:$0xff] }
 0x3a9   :  { %919 = vmatprep.subr.bf16.mxu0 %v2347_v37  ;;  %v2356_v47 = vcombine.low %v787_v44, %v791_v45  ;;  %v2357_v48 = vcombine.high %v787_v44, %v791_v45  ;;  %v2352_v56 = vcombine.low %v781_v51, %v785_v54  ;;  %v2353_v57 = vcombine.high %v781_v51, %v785_v54  ;;  %v2332_v58 = vld [vmem:[%s3750_s24] ss:$0 sm:$0xff]  ;;  %v2696_v34 = vld [vmem:[%s3755_s18 + $0x24] ss:$8 sps:$4 sm:$0xff]   ;;  %v2702_v38 = vld [vmem:[%s3755_s18 + $0x34] ss:$8 sps:$4 sm:$0xff]  }
 0x3aa   :  { %920 = vmatpush1.bf16.msra.mxu0 %v2346_v39  ;;  %v2711_v35 = vld [vmem:[%s3755_s18 + $0x224] ss:$8 sps:$4 sm:$0xff]   ;;  %v2694_v36 = vld [vmem:[%s3755_s18 + $0x20] ss:$8 sps:$4 sm:$0xff]   ;;  %v2717_v39 = vld [vmem:[%s3755_s18 + $0x234] ss:$8 sps:$4 sm:$0xff]  }
 0x3ab   :  { %v2709_v37 = vld [vmem:[%s3755_s18 + $0x220] ss:$8 sps:$4 sm:$0xff]   ;;  %v2714_v45 = vld [vmem:[%s3755_s18 + $0x54] ss:$8 sps:$4 sm:$0xff]   ;;  %v2720_v49 = vld [vmem:[%s3755_s18 + $0x64] ss:$8 sps:$4 sm:$0xff]  }
 0x3ac   :  { %v2706_v44 = vld [vmem:[%s3755_s18 + $0x40] ss:$8 sps:$4 sm:$0xff]   ;;  %v2735_v50 = vld [vmem:[%s3755_s18 + $0x264] ss:$8 sps:$4 sm:$0xff]   ;;  %v2741_v54 = vld [vmem:[%s3755_s18 + $0x274] ss:$8 sps:$4 sm:$0xff]  }
 0x3ad   :  { %v2718_v51 = vld [vmem:[%s3755_s18 + $0x60] ss:$8 sps:$4 sm:$0xff]  }
 0x43c   :  { %v484_v12 = vpop.f32.mrb[8].mxu0 }
 0x43d   :  { %v485_v13 = vadd.f32 %v2328_v11, %v484_v12  ;;  %v2564_v14 = vpop.f32.mrb[9].mxu0 }
 0x43e   :  { %v487_v15 = vpop.f32.mrb[10].mxu0 }
 0x43f   :  { %v490_v16 = vmax.f32 %v485_v13, 0.0  ;;  %v2565_v17 = vpop.f32.mrb[11].mxu0  ;;  %v788_v15 = vld [vmem:[%s3749_s25 + $0x50] sm:$0xff] }
 0x440   :  { %v789_v17 = vld [vmem:[%s3749_s25 + $0x58] sm:$0xff] }
 0x441   :  { %v491_v19 = vpack.c.bf16 %v490_v16, %v490_v16  ;;  %v792_v16 = vld [vmem:[%s3749_s25 + $0x70] sm:$0xff] }
 0x443   :  { %2569 = vmatmul.mubr.msk.bf16.vlgmr.msra.gmra.mrb[4].mxu1 %vm377_vm3, %v491_v19 }
 0x444   :  { %2579 = vmatpush3.bf16.msra.mxu1 %v2686_v18  ;;  %v606_v21 = vpop.f32.mrb[12].mxu0  ;;  %2580 = vmatprep.mubr.msk.bf16.mxu1 %vm3141_vm0, %v3140_v1  ;;  %v793_v18 = vld [vmem:[%s3749_s25 + $0x78] sm:$0xff] }
 0x445   :  { %v607_v22 = vadd.f32 %v2335_v20, %v606_v21  ;;  %v2576_v23 = vpop.f32.mrb[13].mxu0  ;;  %2590 = vmatprep.subr.bf16.mxu1 %v3140_v1  ;;  %v2359_v21 = vcombine.high %v788_v15, %v792_v16 }
 0x446   :  { %v609_v24 = vpop.f32.mrb[14].mxu0  ;;  %v2358_v23 = vcombine.low %v788_v15, %v792_v16  ;;  %v2768_v15 = vld [vmem:[%s3755_s18 + $0xe4] ss:$8 sps:$4 sm:$0xff]  }
 0x447   :  { %v612_v25 = vmax.f32 %v607_v22, 0.0  ;;  %v2577_v27 = vpop.f32.mrb[15].mxu0  ;;  %v2361_v22 = vcombine.high %v789_v17, %v793_v18  ;;  %v2360_v24 = vcombine.low %v789_v17, %v793_v18  ;;  %v2771_v16 = vld [vmem:[%s3755_s18 + $0x2c4] ss:$8 sps:$4 sm:$0xff]   ;;  %v2766_v17 = vld [vmem:[%s3755_s18 + $0xe0] ss:$8 sps:$4 sm:$0xff]  }
 0x448   :  { %v2699_v27 = vld [vmem:[%s3755_s18 + $0x204] ss:$8 sps:$4 sm:$0xff]   ;;  %v2769_v18 = vld [vmem:[%s3755_s18 + $0x2c0] ss:$8 sps:$4 sm:$0xff]  }
 0x449   :  { %v613_v29 = vpack.c.bf16 %v612_v25, %v612_v25  ;;  %v2690_v25 = vld [vmem:[%s3755_s18 + $0x4] ss:$8 sps:$4 sm:$0xff]  }
 0x44b   :  { %2581 = vmatmul.mubr.msk.bf16.vlgmr.msra.gmra.mrb[8].mxu1 %vm377_vm3, %v613_v29  ;;  %v2697_v29 = vld [vmem:[%s3755_s18 + $0x200] ss:$8 sps:$4 sm:$0xff]  }
 0x44c   :  { %2591 = vmatpush3.bf16.msra.mxu1 %v2687_v28  ;;  %v716_v30 = vpop.f32.mrb[16].mxu0  ;;  %2592 = vmatprep.mubr.msk.bf16.mxu1 %vm3141_vm0, %v3140_v1  ;;  %v786_v1 = vld [vmem:[%s3749_s25 + $0x40] sm:$0xff] }
 0x44d   :  { %v2588_v31 = vpop.f32.mrb[17].mxu0  ;;  %960 = vmatprep.subr.bf16.mxu1 %v2349_v41  ;;  %v2354_v46 = vcombine.low %v786_v1, %v790_v42  ;;  %v2688_v28 = vld [vmem:[%s3755_s18] ss:$8 sps:$4 sm:$0xff]   ;;  %v2715_v41 = vld [vmem:[%s3755_s18 + $0x230] ss:$8 sps:$4 sm:$0xff]  }
 0x44e   :  { %v719_v32 = vpop.f32.mrb[18].mxu0  ;;  %v2705_v31 = vld [vmem:[%s3755_s18 + $0x214] ss:$8 sps:$4 sm:$0xff]  }
 0x44f   :  { %v2589_v33 = vpop.f32.mrb[19].mxu0  ;;  %v2691_v32 = vld [vmem:[%s3755_s18 + $0x10] ss:$8 sps:$4 sm:$0xff]  }
 0x450   :  { %v2703_v33 = vld [vmem:[%s3755_s18 + $0x210] ss:$8 sps:$4 sm:$0xff]  }
 0x453   :  { %2593 = vmatmul.mubr.msk.bf16.vlgmr.msra.gmra.mrb[12].mxu1 %vm377_vm3, %v3411_v43  ;;  %v2355_v43 = vcombine.high %v786_v1, %v790_v42  ;;  %v2708_v1 = vld [vmem:[%s3755_s18 + $0x44] ss:$8 sps:$4 sm:$0xff]  }
 0x454   :  { %961 = vmatpush1.bf16.msra.mxu1 %v2348_v40  ;;  %992 = vmatprep.mubr.bf16.mxu1 %v3152_v55  ;;  %v2700_v40 = vld [vmem:[%s3755_s18 + $0x30] ss:$8 sps:$4 sm:$0xff]   ;;  %v2723_v42 = vld [vmem:[%s3755_s18 + $0x244] ss:$8 sps:$4 sm:$0xff]  }
 0x455   :  { %921 = vmatprep.subr.bf16.mxu0 %v2355_v43  ;;  %962 = vmatprep.subr.bf16.mxu1 %v2357_v48  ;;  %v2721_v43 = vld [vmem:[%s3755_s18 + $0x240] ss:$8 sps:$4 sm:$0xff]   ;;  %v2727_v48 = vld [vmem:[%s3755_s18 + $0x250] ss:$8 sps:$4 sm:$0xff]  }
 0x456   :  { %922 = vmatpush1.bf16.msra.mxu0 %v2354_v46  ;;  %v2729_v46 = vld [vmem:[%s3755_s18 + $0x254] ss:$8 sps:$4 sm:$0xff]  }
 0x457   :  { %1001 = vmatprep.subr.bf16.mxu0 %v2351_v53  ;;  %v2726_v53 = vld [vmem:[%s3755_s18 + $0x74] ss:$8 sps:$4 sm:$0xff]  }
 0x458   :  { %963 = vmatpush1.bf16.msra.mxu1 %v2356_v47  ;;  %v2712_v47 = vld [vmem:[%s3755_s18 + $0x50] ss:$8 sps:$4 sm:$0xff]  }
 0x459   :  { %1042 = vmatprep.subr.bf16.mxu1 %v2353_v57  ;;  %v2732_v57 = vld [vmem:[%s3755_s18 + $0x84] ss:$8 sps:$4 sm:$0xff]  }
 0x516   :  { %v544_v59 = vpop.f32.mrb[4].mxu1 }
 0x517   :  { %v545_v60 = vadd.f32 %v2332_v58, %v544_v59  ;;  %v2570_v61 = vpop.f32.mrb[5].mxu1  ;;  %v2747_v58 = vld [vmem:[%s3755_s18 + $0x284] ss:$8 sps:$4 sm:$0xff]   ;;  %v2730_v59 = vld [vmem:[%s3755_s18 + $0x80] ss:$8 sps:$4 sm:$0xff]  }
 0x518   :  { %v547_v62 = vpop.f32.mrb[6].mxu1  ;;  %v2738_v61 = vld [vmem:[%s3755_s18 + $0x94] ss:$8 sps:$4 sm:$0xff]  }
 0x519   :  { %2108 = vst.msk [vmem:[%s3751_s20] sm:$0xff] %vm2107_vm6, %v545_v60  ;;  %v2571_v63 = vpop.f32.mrb[7].mxu1  ;;  %v2745_v60 = vld [vmem:[%s3755_s18 + $0x280] ss:$8 sps:$4 sm:$0xff]   ;;  %v2753_v62 = vld [vmem:[%s3755_s18 + $0x294] ss:$8 sps:$4 sm:$0xff]  }
 0x51a   :  { %v2736_v63 = vld [vmem:[%s3755_s18 + $0x90] ss:$8 sps:$4 sm:$0xff]  }
 0x51e   :  { %v666_v2 = vpop.f32.mrb[8].mxu1 }
 0x51f   :  { %v667_v3 = vadd.f32 %v2338_v0, %v666_v2  ;;  %v2582_v4 = vpop.f32.mrb[9].mxu1  ;;  %v2751_v0 = vld [vmem:[%s3755_s18 + $0x290] ss:$8 sps:$4 sm:$0xff]   ;;  %v2744_v2 = vld [vmem:[%s3755_s18 + $0xa4] ss:$8 sps:$4 sm:$0xff]  }
 0x520   :  { %v669_v5 = vpop.f32.mrb[10].mxu1  ;;  %v2742_v4 = vld [vmem:[%s3755_s18 + $0xa0] ss:$8 sps:$4 sm:$0xff]  }
 0x521   :  { %2109 = vst.msk [vmem:[%s3753_s15] sm:$0xff] %vm2107_vm6, %v667_v3  ;;  %v2583_v6 = vpop.f32.mrb[11].mxu1  ;;  %v2759_v3 = vld [vmem:[%s3755_s18 + $0x2a4] ss:$8 sps:$4 sm:$0xff]   ;;  %v2757_v5 = vld [vmem:[%s3755_s18 + $0x2a0] ss:$8 sps:$4 sm:$0xff]  }
 0x522   :  { %v2750_v6 = vld [vmem:[%s3755_s18 + $0xb4] ss:$8 sps:$4 sm:$0xff]  }
 0x526   :  { %v762_v8 = vpop.f32.mrb[12].mxu1 }
 0x527   :  { %v763_v10 = vadd.f32 %v762_v8, %v716_v30  ;;  %v2594_v11 = vpop.f32.mrb[13].mxu1  ;;  %v2693_v30 = vld [vmem:[%s3755_s18 + $0x14] ss:$8 sps:$4 sm:$0xff]  }
 0x528   :  { %v765_v12 = vpop.f32.mrb[14].mxu1  ;;  %v2765_v8 = vld [vmem:[%s3755_s18 + $0x2b4] ss:$8 sps:$4 sm:$0xff]   ;;  %v2756_v11 = vld [vmem:[%s3755_s18 + $0xc4] ss:$8 sps:$4 sm:$0xff]  }
 0x529   :  { %v775_v13 = vadd.f32 %v2345_v9, %v763_v10  ;;  %v2595_v14 = vpop.f32.mrb[15].mxu1  ;;  %v2748_v9 = vld [vmem:[%s3755_s18 + $0xb0] ss:$8 sps:$4 sm:$0xff]   ;;  %v2754_v12 = vld [vmem:[%s3755_s18 + $0xc0] ss:$8 sps:$4 sm:$0xff]  }
 0x52a   :  { %v2763_v10 = vld [vmem:[%s3755_s18 + $0x2b0] ss:$8 sps:$4 sm:$0xff]  }
 0x52b   :  { %v776_v19 = vmax.f32 %v775_v13, 0.0  ;;  %v2762_v13 = vld [vmem:[%s3755_s18 + $0xd4] ss:$8 sps:$4 sm:$0xff]   ;;  %v2760_v14 = vld [vmem:[%s3755_s18 + $0xd0] ss:$8 sps:$4 sm:$0xff]  }
 0x52d   :  { %v777_v20 = vpack.c.bf16 %v776_v19, %v776_v19  ;;  %v2774_v19 = vld [vmem:[%s3755_s18 + $0xf4] ss:$8 sps:$4 sm:$0xff]  }
 0x52f   :  { %2362 = vmatmul.mubr.msk.bf16.vlgmr.msra.gmra.mrb[20].mxu0 %vm446_vm4, %v777_v20  ;;  %2363 = vmatmul.mubr.msk.bf16.vlgmr.msra.gmra.mrb[16].mxu1 %vm446_vm4, %v777_v20 }
 0x530   :  { %1002 = vmatpush1.bf16.msra.mxu0 %v2350_v52  ;;  %1043 = vmatpush1.bf16.msra.mxu1 %v2352_v56  ;;  %v2733_v52 = vld [vmem:[%s3755_s18 + $0x260] ss:$8 sps:$4 sm:$0xff]   ;;  %v2739_v56 = vld [vmem:[%s3755_s18 + $0x270] ss:$8 sps:$4 sm:$0xff]  }
 0x531   :  { %1003 = vmatprep.subr.bf16.mxu0 %v2359_v21  ;;  %1044 = vmatprep.subr.bf16.mxu1 %v2361_v22  ;;  %v2772_v21 = vld [vmem:[%s3755_s18 + $0xf0] ss:$8 sps:$4 sm:$0xff]  }
 0x532   :  { %1033 = vmatprep.mubr.bf16.mxu0 %v3152_v55  ;;  %1074 = vmatprep.mubr.bf16.mxu1 %v3152_v55  ;;  %v2724_v55 = vld [vmem:[%s3755_s18 + $0x70] ss:$8 sps:$4 sm:$0xff]  }
 0x533   :  { %v2775_v22 = vld [vmem:[%s3755_s18 + $0x2d0] ss:$8 sps:$4 sm:$0xff]  }
 0x534   :  { %1004 = vmatpush1.bf16.msra.mxu0 %v2358_v23  ;;  %1045 = vmatpush1.bf16.msra.mxu1 %v2360_v24  ;;  %v2780_v23 = vld [vmem:[%s3755_s18 + $0x104] ss:$8 sps:$4 sm:$0xff]  }
 0x535   :  { %1879 = vmatprep.subr.bf16.mxu1 %v2690_v25  ;;  %1961 = vmatprep.subr.bf16.mxu0 %v2699_v27  ;;  %v2783_v24 = vld [vmem:[%s3755_s18 + $0x2e4] ss:$8 sps:$4 sm:$0xff]   ;;  %v2781_v25 = vld [vmem:[%s3755_s18 + $0x2e0] ss:$8 sps:$4 sm:$0xff]   ;;  %v2789_v27 = vld [vmem:[%s3755_s18 + $0x2f4] ss:$8 sps:$4 sm:$0xff]  }
 0x537   :  { %2364 = vmatmul.mubr.msk.bf16.vlgmr.msra.gmra.mrb[24].mxu0 %vm446_vm4, %v777_v20  ;;  %2365 = vmatmul.mubr.msk.bf16.vlgmr.msra.gmra.mrb[20].mxu1 %vm446_vm4, %v777_v20  ;;  %v2777_v20 = vld [vmem:[%s3755_s18 + $0x2d4] ss:$8 sps:$4 sm:$0xff]  }
 0x538   :  { %1880 = vmatpush1.bf16.msra.mxu1 %v2688_v28  ;;  %1962 = vmatpush1.bf16.msra.mxu0 %v2697_v29  ;;  %v2787_v28 = vld [vmem:[%s3755_s18 + $0x2f0] ss:$8 sps:$4 sm:$0xff]   ;;  %v2795_v29 = vld [vmem:[%s3755_s18 + $0x304] ss:$8 sps:$4 sm:$0xff]  }
 0x539   :  { %1881 = vmatprep.subr.bf16.mxu1 %v2693_v30  ;;  %1963 = vmatprep.subr.bf16.mxu0 %v2705_v31  ;;  %v796_v30 = vlaneseq }
 0x53b   :  { %v3555_v31 = vshrl.u32 %v796_v30, 7  ;;  %v2805_v30 = vld [vmem:[%s3755_s18 + $0x320] ss:$8 sps:$4 sm:$0xff]  }
 0x53c   :  { %1882 = vmatpush1.bf16.msra.mxu1 %v2691_v32  ;;  %1964 = vmatpush1.bf16.msra.mxu0 %v2703_v33  ;;  %v3559_v33 = vld [vmem:[%s3756_s22] sm:$0xff] }
 0x53d   :  { %1883 = vmatprep.subr.bf16.mxu1 %v2696_v34  ;;  %1965 = vmatprep.subr.bf16.mxu0 %v2711_v35  ;;  %v798_v32 = vsub.s32 0, %v3555_v31  ;;  %v802_v34 = vsub.s32 1, %v3555_v31  ;;  %v810_v35 = vsub.s32 3, %v3555_v31 }
 0x540   :  { %1884 = vmatpush1.bf16.msra.mxu1 %v2694_v36  ;;  %1966 = vmatpush1.bf16.msra.mxu0 %v2709_v37  ;;  %v799_v36 = vrot.slane %v3559_v33, %v798_v32  ;;  %v803_v37 = vrot.slane %v3559_v33, %v802_v34 }
 0x541   :  { %1885 = vmatprep.subr.bf16.mxu1 %v2702_v38  ;;  %1967 = vmatprep.subr.bf16.mxu0 %v2717_v39  ;;  %v811_v38 = vrot.slane %v3559_v33, %v810_v35  ;;  %v2810_v35 = vld [vmem:[%s3755_s18 + $0x154] ss:$8 sps:$4 sm:$0xff]  }
 0x544   :  { %1886 = vmatpush1.bf16.msra.mxu1 %v2700_v40  ;;  %1968 = vmatpush1.bf16.msra.mxu0 %v2715_v41 }
 0x545   :  { %1887 = vmatprep.subr.bf16.mxu1 %v2708_v1  ;;  %1969 = vmatprep.subr.bf16.mxu0 %v2723_v42 }
 0x548   :  { %1888 = vmatpush1.bf16.msra.mxu1 %v2706_v44  ;;  %1970 = vmatpush1.bf16.msra.mxu0 %v2721_v43  ;;  %v814_v44 = vsub.s32 4, %v3555_v31 }
 0x549   :  { %1889 = vmatprep.subr.bf16.mxu1 %v2714_v45  ;;  %1971 = vmatprep.subr.bf16.mxu0 %v2729_v46 }
 0x54c   :  { %1890 = vmatpush1.bf16.msra.mxu1 %v2712_v47  ;;  %1972 = vmatpush1.bf16.msra.mxu0 %v2727_v48  ;;  %v818_v48 = vsub.s32 5, %v3555_v31 }
 0x54d   :  { %1891 = vmatprep.subr.bf16.mxu1 %v2720_v49  ;;  %1973 = vmatprep.subr.bf16.mxu0 %v2735_v50  ;;  %v826_v49 = vsub.s32 7, %v3555_v31 }
 0x550   :  { %1892 = vmatpush1.bf16.msra.mxu1 %v2718_v51  ;;  %1974 = vmatpush1.bf16.msra.mxu0 %v2733_v52 }
 0x551   :  { %1893 = vmatprep.subr.bf16.mxu1 %v2726_v53  ;;  %1975 = vmatprep.subr.bf16.mxu0 %v2741_v54 }
 0x554   :  { %1894 = vmatpush1.bf16.msra.mxu1 %v2724_v55  ;;  %1976 = vmatpush1.bf16.msra.mxu0 %v2739_v56  ;;  %v815_v55 = vrot.slane %v3559_v33, %v814_v44  ;;  %v2822_v44 = vld [vmem:[%s3755_s18 + $0x174] ss:$8 sps:$4 sm:$0xff]  }
 0x555   :  { %1895 = vmatprep.subr.bf16.mxu1 %v2732_v57  ;;  %1977 = vmatprep.subr.bf16.mxu0 %v2747_v58  ;;  %v2778_v57 = vld [vmem:[%s3755_s18 + $0x100] ss:$8 sps:$4 sm:$0xff]   ;;  %v819_v58 = vrot.slane %v3559_v33, %v818_v48  ;;  %v2831_v48 = vld [vmem:[%s3755_s18 + $0x364] ss:$8 sps:$4 sm:$0xff]  }
 0x558   :  { %1896 = vmatpush1.bf16.msra.mxu1 %v2730_v59  ;;  %1978 = vmatpush1.bf16.msra.mxu0 %v2745_v60  ;;  %v827_v59 = vrot.slane %v3559_v33, %v826_v49  ;;  %v2826_v49 = vld [vmem:[%s3755_s18 + $0x180] ss:$8 sps:$4 sm:$0xff]  }
 0x559   :  { %1897 = vmatprep.subr.bf16.mxu1 %v2738_v61  ;;  %1979 = vmatprep.subr.bf16.mxu0 %v2753_v62  ;;  %v2786_v61 = vld [vmem:[%s3755_s18 + $0x114] ss:$8 sps:$4 sm:$0xff]  }
 0x55c   :  { %1898 = vmatpush1.bf16.msra.mxu1 %v2736_v63  ;;  %1980 = vmatpush1.bf16.msra.mxu0 %v2751_v0 }
 0x55d   :  { %1899 = vmatprep.subr.bf16.mxu1 %v2744_v2  ;;  %1981 = vmatprep.subr.bf16.mxu0 %v2759_v3 }
 0x560   :  { %1900 = vmatpush1.bf16.msra.mxu1 %v2742_v4  ;;  %1982 = vmatpush1.bf16.msra.mxu0 %v2757_v5 }
 0x561   :  { %1901 = vmatprep.subr.bf16.mxu1 %v2750_v6  ;;  %1983 = vmatprep.subr.bf16.mxu0 %v2765_v8 }
 0x564   :  { %1902 = vmatpush1.bf16.msra.mxu1 %v2748_v9  ;;  %1984 = vmatpush1.bf16.msra.mxu0 %v2763_v10  ;;  %v2784_v10 = vld [vmem:[%s3755_s18 + $0x110] ss:$8 sps:$4 sm:$0xff]  }
 0x565   :  { %1903 = vmatprep.subr.bf16.mxu1 %v2756_v11  ;;  %1985 = vmatprep.subr.bf16.mxu0 %v2771_v16 }
 0x568   :  { %1904 = vmatpush1.bf16.msra.mxu1 %v2754_v12  ;;  %1986 = vmatpush1.bf16.msra.mxu0 %v2769_v18  ;;  %v2790_v18 = vld [vmem:[%s3755_s18 + $0x120] ss:$8 sps:$4 sm:$0xff]  }
 0x569   :  { %1905 = vmatprep.subr.bf16.mxu1 %v2762_v13  ;;  %1987 = vmatprep.subr.bf16.mxu0 %v2777_v20 }
 0x56c   :  { %1906 = vmatpush1.bf16.msra.mxu1 %v2760_v14  ;;  %1988 = vmatpush1.bf16.msra.mxu0 %v2775_v22  ;;  %v2792_v14 = vld [vmem:[%s3755_s18 + $0x124] ss:$8 sps:$4 sm:$0xff]   ;;  %v2801_v22 = vld [vmem:[%s3755_s18 + $0x314] ss:$8 sps:$4 sm:$0xff]  }
 0x56d   :  { %1907 = vmatprep.subr.bf16.mxu1 %v2768_v15  ;;  %1989 = vmatprep.subr.bf16.mxu0 %v2783_v24  ;;  %v2796_v24 = vld [vmem:[%s3755_s18 + $0x130] ss:$8 sps:$4 sm:$0xff]  }
 0x570   :  { %1908 = vmatpush1.bf16.msra.mxu1 %v2766_v17  ;;  %1990 = vmatpush1.bf16.msra.mxu0 %v2781_v25  ;;  %v2799_v25 = vld [vmem:[%s3755_s18 + $0x310] ss:$8 sps:$4 sm:$0xff]  }
 0x571   :  { %1909 = vmatprep.subr.bf16.mxu1 %v2774_v19  ;;  %1991 = vmatprep.subr.bf16.mxu0 %v2789_v27  ;;  %v2793_v19 = vld [vmem:[%s3755_s18 + $0x300] ss:$8 sps:$4 sm:$0xff]   ;;  %v2804_v27 = vld [vmem:[%s3755_s18 + $0x144] ss:$8 sps:$4 sm:$0xff]  }
 0x574   :  { %1910 = vmatpush1.bf16.msra.mxu1 %v2772_v21  ;;  %1992 = vmatpush1.bf16.msra.mxu0 %v2787_v28  ;;  %v2798_v21 = vld [vmem:[%s3755_s18 + $0x134] ss:$8 sps:$4 sm:$0xff]   ;;  %v2807_v28 = vld [vmem:[%s3755_s18 + $0x324] ss:$8 sps:$4 sm:$0xff]  }
 0x575   :  { %1920 = vmatprep.subr.bf16.mxu1 %v2780_v23  ;;  %2002 = vmatprep.subr.bf16.mxu0 %v2795_v29  ;;  %v2802_v29 = vld [vmem:[%s3755_s18 + $0x140] ss:$8 sps:$4 sm:$0xff]  }
 0x602   :  { %v953_v39 = vpop.f32.mrb[20].mxu0  ;;  %v3570_v40 = vpop.f32.mrb[16].mxu1 }
 0x603   :  { %v954_v41 = vadd.f32 %v953_v39, %v799_v36  ;;  %v955_v1 = vpop.f32.mrb[21].mxu0  ;;  %v996_v42 = vpop.f32.mrb[17].mxu1  ;;  %v2813_v36 = vld [vmem:[%s3755_s18 + $0x334] ss:$8 sps:$4 sm:$0xff]   ;;  %v2816_v39 = vld [vmem:[%s3755_s18 + $0x164] ss:$8 sps:$4 sm:$0xff]  }
 0x604   :  { %v956_v43 = vadd.f32 %v955_v1, %v803_v37  ;;  %v997_v45 = vadd.f32 %v996_v42, %v811_v38  ;;  %v957_v46 = vpop.f32.mrb[22].mxu0  ;;  %v998_v47 = vpop.f32.mrb[18].mxu1  ;;  %v2808_v37 = vld [vmem:[%s3755_s18 + $0x150] ss:$8 sps:$4 sm:$0xff]   ;;  %v2814_v1 = vld [vmem:[%s3755_s18 + $0x160] ss:$8 sps:$4 sm:$0xff]  }
 0x605   :  { %v1083_v50 = vmax.f32 %v954_v41, 0.0  ;;  %v958_v51 = vpop.f32.mrb[23].mxu0  ;;  %v999_v52 = vpop.f32.mrb[19].mxu1  ;;  %v2811_v38 = vld [vmem:[%s3755_s18 + $0x330] ss:$8 sps:$4 sm:$0xff]  }
 0x606   :  { %v1084_v53 = vmax.f32 %v956_v43, 0.0  ;;  %v1086_v54 = vmax.f32 %v997_v45, 0.0  ;;  %v2819_v41 = vld [vmem:[%s3755_s18 + $0x344] ss:$8 sps:$4 sm:$0xff]   ;;  %v2817_v42 = vld [vmem:[%s3755_s18 + $0x340] ss:$8 sps:$4 sm:$0xff]  }
 0x607   :  { %v1091_v60 = vpack.c.bf16 %v1083_v50, %v1083_v50  ;;  %v2825_v43 = vld [vmem:[%s3755_s18 + $0x354] ss:$8 sps:$4 sm:$0xff]   ;;  %v2820_v45 = vld [vmem:[%s3755_s18 + $0x170] ss:$8 sps:$4 sm:$0xff]   ;;  %v2828_v47 = vld [vmem:[%s3755_s18 + $0x184] ss:$8 sps:$4 sm:$0xff]  }
 0x608   :  { %v1092_v56 = vpack.c.bf16 %v1084_v53, %v1084_v53  ;;  %v1094_v62 = vpack.c.bf16 %v1086_v54, %v1086_v54  ;;  %v2823_v46 = vld [vmem:[%s3755_s18 + $0x350] ss:$8 sps:$4 sm:$0xff]   ;;  %v2829_v50 = vld [vmem:[%s3755_s18 + $0x360] ss:$8 sps:$4 sm:$0xff]   ;;  %v2834_v51 = vld [vmem:[%s3755_s18 + $0x194] ss:$8 sps:$4 sm:$0xff]  }
 0x609   :  { %v2837_v52 = vld [vmem:[%s3755_s18 + $0x374] ss:$8 sps:$4 sm:$0xff]   ;;  %v2832_v53 = vld [vmem:[%s3755_s18 + $0x190] ss:$8 sps:$4 sm:$0xff]  }
 0x60a   :  { %v1035_v63 = vpop.f32.mrb[24].mxu0  ;;  %v3580_v0 = vpop.f32.mrb[20].mxu1  ;;  %1911 = vmatprep.mubr.bf16.mxu1 %v1092_v56  ;;  %v2835_v54 = vld [vmem:[%s3755_s18 + $0x370] ss:$8 sps:$4 sm:$0xff]   ;;  %v2843_v56 = vld [vmem:[%s3755_s18 + $0x384] ss:$8 sps:$4 sm:$0xff]  }
 0x60b   :  { %v1036_v2 = vadd.f32 %v1035_v63, %v815_v55  ;;  %v1037_v3 = vpop.f32.mrb[25].mxu0  ;;  %v1078_v4 = vpop.f32.mrb[21].mxu1  ;;  %1912 = vmatmul.mubr.bf16.vlgmr.msra.gmra.mrb[24].mxu1 %v1091_v60  ;;  %v2840_v55 = vld [vmem:[%s3755_s18 + $0x1a4] ss:$8 sps:$4 sm:$0xff]   ;;  %v2849_v60 = vld [vmem:[%s3755_s18 + $0x394] ss:$8 sps:$4 sm:$0xff]  }
 0x60c   :  { %v1038_v5 = vadd.f32 %v1037_v3, %v819_v58  ;;  %v1079_v6 = vadd.f32 %v1078_v4, %v827_v59  ;;  %1921 = vmatpush1.bf16.msra.mxu1 %v2778_v57  ;;  %v1039_v8 = vpop.f32.mrb[26].mxu0  ;;  %v1080_v9 = vpop.f32.mrb[22].mxu1  ;;  %1952 = vmatprep.mubr.bf16.mxu1 %v1094_v62  ;;  %v2838_v57 = vld [vmem:[%s3755_s18 + $0x1a0] ss:$8 sps:$4 sm:$0xff]   ;;  %v2846_v59 = vld [vmem:[%s3755_s18 + $0x1b4] ss:$8 sps:$4 sm:$0xff]  }
 0x60d   :  { %v1087_v11 = vmax.f32 %v1036_v2, 0.0  ;;  %v1040_v12 = vpop.f32.mrb[27].mxu0  ;;  %v1081_v13 = vpop.f32.mrb[23].mxu1  ;;  %1922 = vmatprep.subr.bf16.mxu1 %v2786_v61  ;;  %v2841_v58 = vld [vmem:[%s3755_s18 + $0x380] ss:$8 sps:$4 sm:$0xff]  }
 0x60e   :  { %v1088_v15 = vmax.f32 %v1038_v5, 0.0  ;;  %v1090_v16 = vmax.f32 %v1079_v6, 0.0  ;;  %v2844_v61 = vld [vmem:[%s3755_s18 + $0x1b0] ss:$8 sps:$4 sm:$0xff]   ;;  %v2852_v63 = vld [vmem:[%s3755_s18 + $0x1c4] ss:$8 sps:$4 sm:$0xff]  }
 0x60f   :  { %v1095_v20 = vpack.c.bf16 %v1087_v11, %v1087_v11  ;;  %v2847_v62 = vld [vmem:[%s3755_s18 + $0x390] ss:$8 sps:$4 sm:$0xff]   ;;  %v2855_v2 = vld [vmem:[%s3755_s18 + $0x3a4] ss:$8 sps:$4 sm:$0xff]   ;;  %v2850_v3 = vld [vmem:[%s3755_s18 + $0x1c0] ss:$8 sps:$4 sm:$0xff]  }
 0x610   :  { %v1096_v17 = vpack.c.bf16 %v1088_v15, %v1088_v15  ;;  %1923 = vmatpush1.bf16.msra.mxu1 %v2784_v10  ;;  %v1098_v23 = vpack.c.bf16 %v1090_v16, %v1090_v16  ;;  %v2853_v4 = vld [vmem:[%s3755_s18 + $0x3a0] ss:$8 sps:$4 sm:$0xff]   ;;  %v806_v5 = vsub.s32 2, %v3555_v31  ;;  %v2858_v6 = vld [vmem:[%s3755_s18 + $0x1d4] ss:$8 sps:$4 sm:$0xff]  }
 0x611   :  { %1924 = vmatprep.subr.bf16.mxu1 %v2792_v14  ;;  %v2861_v8 = vld [vmem:[%s3755_s18 + $0x3b4] ss:$8 sps:$4 sm:$0xff]   ;;  %v2856_v9 = vld [vmem:[%s3755_s18 + $0x1d0] ss:$8 sps:$4 sm:$0xff]   ;;  %v2864_v12 = vld [vmem:[%s3755_s18 + $0x1e4] ss:$8 sps:$4 sm:$0xff]  }
 0x612   :  { %1993 = vmatprep.mubr.bf16.mxu0 %v1096_v17  ;;  %v2859_v10 = vld [vmem:[%s3755_s18 + $0x3b0] ss:$8 sps:$4 sm:$0xff]   ;;  %v807_v11 = vrot.slane %v3559_v33, %v806_v5  ;;  %v2867_v13 = vld [vmem:[%s3755_s18 + $0x3c4] ss:$8 sps:$4 sm:$0xff]   ;;  %v2862_v14 = vld [vmem:[%s3755_s18 + $0x1e0] ss:$8 sps:$4 sm:$0xff]  }
 0x613   :  { %1994 = vmatmul.mubr.bf16.vlgmr.msra.gmra.mrb[28].mxu0 %v1095_v20  ;;  %v2865_v15 = vld [vmem:[%s3755_s18 + $0x3c0] ss:$8 sps:$4 sm:$0xff]   ;;  %v822_v17 = vsub.s32 6, %v3555_v31  ;;  %v2868_v20 = vld [vmem:[%s3755_s18 + $0x1f0] ss:$8 sps:$4 sm:$0xff]  }
 0x614   :  { %1925 = vmatpush1.bf16.msra.mxu1 %v2790_v18  ;;  %2003 = vmatpush1.bf16.msra.mxu0 %v2793_v19  ;;  %v995_v16 = vadd.f32 %v3570_v40, %v807_v11  ;;  %v2870_v18 = vld [vmem:[%s3755_s18 + $0x1f4] ss:$8 sps:$4 sm:$0xff]   ;;  %v2874_v40 = vld [vmem:[%s3755_s18 + $0x3e0] ss:$8 sps:$4 sm:$0xff]  }
 0x615   :  { %2034 = vmatprep.mubr.bf16.mxu0 %v1098_v23  ;;  %1926 = vmatprep.subr.bf16.mxu1 %v2798_v21  ;;  %v2873_v19 = vld [vmem:[%s3755_s18 + $0x3d4] ss:$8 sps:$4 sm:$0xff]   ;;  %v2871_v21 = vld [vmem:[%s3755_s18 + $0x3d0] ss:$8 sps:$4 sm:$0xff]   ;;  %v823_v23 = vrot.slane %v3559_v33, %v822_v17  ;;  %v1227_v33 = vld [vmem:[%s3757_s23] sm:$0x3] }
 0x616   :  { %2004 = vmatprep.subr.bf16.mxu0 %v2801_v22  ;;  %v1085_v22 = vmax.f32 %v995_v16, 0.0 }
 0x618   :  { %1927 = vmatpush1.bf16.msra.mxu1 %v2796_v24  ;;  %2005 = vmatpush1.bf16.msra.mxu0 %v2799_v25  ;;  %v2876_v24 = vld [vmem:[%s3755_s18 + $0x3e4] ss:$8 sps:$4 sm:$0xff]   ;;  %v1093_v25 = vpack.c.bf16 %v1085_v22, %v1085_v22 }
 0x619   :  { %1928 = vmatprep.subr.bf16.mxu1 %v2804_v27  ;;  %2006 = vmatprep.subr.bf16.mxu0 %v2807_v28  ;;  %v1077_v27 = vadd.f32 %v3580_v0, %v823_v23  ;;  %v2879_v28 = vld [vmem:[%s3755_s18 + $0x3f4] ss:$8 sps:$4 sm:$0xff]   ;;  %v1236_v0 = vrot.slane %v1227_v33, %v802_v34 }
 0x61c   :  { %1929 = vmatpush1.bf16.msra.mxu1 %v2802_v29  ;;  %2007 = vmatpush1.bf16.msra.mxu0 %v2805_v30  ;;  %v2877_v29 = vld [vmem:[%s3755_s18 + $0x3f0] ss:$8 sps:$4 sm:$0xff]   ;;  %v1089_v30 = vmax.f32 %v1077_v27, 0.0 }
 0x61d   :  { %1930 = vmatprep.subr.bf16.mxu1 %v2810_v35  ;;  %2008 = vmatprep.subr.bf16.mxu0 %v2813_v36 }
 0x61e   :  { %v1097_v35 = vpack.c.bf16 %v1089_v30, %v1089_v30 }
 0x620   :  { %1931 = vmatpush1.bf16.msra.mxu1 %v2808_v37  ;;  %2009 = vmatpush1.bf16.msra.mxu0 %v2811_v38 }
 0x621   :  { %1932 = vmatprep.subr.bf16.mxu1 %v2816_v39  ;;  %2010 = vmatprep.subr.bf16.mxu0 %v2819_v41  ;;  %v1232_v39 = vrot.slane %v1227_v33, %v798_v32 }
 0x624   :  { %1933 = vmatpush1.bf16.msra.mxu1 %v2814_v1  ;;  %2011 = vmatpush1.bf16.msra.mxu0 %v2817_v42 }
 0x625   :  { %1934 = vmatprep.subr.bf16.mxu1 %v2822_v44  ;;  %2012 = vmatprep.subr.bf16.mxu0 %v2825_v43 }
 0x628   :  { %1935 = vmatpush1.bf16.msra.mxu1 %v2820_v45  ;;  %2013 = vmatpush1.bf16.msra.mxu0 %v2823_v46 }
 0x629   :  { %1936 = vmatprep.subr.bf16.mxu1 %v2828_v47  ;;  %2014 = vmatprep.subr.bf16.mxu0 %v2831_v48 }
 0x62c   :  { %1937 = vmatpush1.bf16.msra.mxu1 %v2826_v49  ;;  %2015 = vmatpush1.bf16.msra.mxu0 %v2829_v50 }
 0x62d   :  { %1938 = vmatprep.subr.bf16.mxu1 %v2834_v51  ;;  %2016 = vmatprep.subr.bf16.mxu0 %v2837_v52 }
 0x630   :  { %1939 = vmatpush1.bf16.msra.mxu1 %v2832_v53  ;;  %2017 = vmatpush1.bf16.msra.mxu0 %v2835_v54 }
 0x631   :  { %1940 = vmatprep.subr.bf16.mxu1 %v2840_v55  ;;  %2018 = vmatprep.subr.bf16.mxu0 %v2843_v56 }
 0x634   :  { %1941 = vmatpush1.bf16.msra.mxu1 %v2838_v57  ;;  %2019 = vmatpush1.bf16.msra.mxu0 %v2841_v58 }
 0x635   :  { %1942 = vmatprep.subr.bf16.mxu1 %v2846_v59  ;;  %2020 = vmatprep.subr.bf16.mxu0 %v2849_v60 }
 0x638   :  { %1943 = vmatpush1.bf16.msra.mxu1 %v2844_v61  ;;  %2021 = vmatpush1.bf16.msra.mxu0 %v2847_v62 }
 0x639   :  { %1944 = vmatprep.subr.bf16.mxu1 %v2852_v63  ;;  %2022 = vmatprep.subr.bf16.mxu0 %v2855_v2 }
 0x63c   :  { %1945 = vmatpush1.bf16.msra.mxu1 %v2850_v3  ;;  %2023 = vmatpush1.bf16.msra.mxu0 %v2853_v4 }
 0x63d   :  { %1946 = vmatprep.subr.bf16.mxu1 %v2858_v6  ;;  %2024 = vmatprep.subr.bf16.mxu0 %v2861_v8 }
 0x640   :  { %1947 = vmatpush1.bf16.msra.mxu1 %v2856_v9  ;;  %2025 = vmatpush1.bf16.msra.mxu0 %v2859_v10 }
 0x641   :  { %1948 = vmatprep.subr.bf16.mxu1 %v2864_v12  ;;  %2026 = vmatprep.subr.bf16.mxu0 %v2867_v13 }
 0x644   :  { %1949 = vmatpush1.bf16.msra.mxu1 %v2862_v14  ;;  %2027 = vmatpush1.bf16.msra.mxu0 %v2865_v15 }
 0x645   :  { %1950 = vmatprep.subr.bf16.mxu1 %v2870_v18  ;;  %2028 = vmatprep.subr.bf16.mxu0 %v2873_v19 }
 0x648   :  { %1951 = vmatpush1.bf16.msra.mxu1 %v2868_v20  ;;  %2029 = vmatpush1.bf16.msra.mxu0 %v2871_v21 }
 0x649   :  { %2030 = vmatprep.subr.bf16.mxu0 %v2876_v24 }
 0x64b   :  { %1953 = vmatmul.mubr.bf16.vlgmr.msra.gmra.mrb[24].mxu1 %v1093_v25 }
 0x64c   :  { %2031 = vmatpush1.bf16.msra.mxu0 %v2874_v40 }
 0x64d   :  { %2032 = vmatprep.subr.bf16.mxu0 %v2879_v28 }
 0x650   :  { %2033 = vmatpush1.bf16.msra.mxu0 %v2877_v29 }
 0x653   :  { %2035 = vmatmul.mubr.bf16.vlgmr.msra.gmra.mrb[28].mxu0 %v1097_v35 }
 0x71e   :  { %v1954_v36 = vpop.f32.mrb[24].mxu1 }
 0x71f   :  { %v1956_v37 = vpop.f32.mrb[25].mxu1  ;;  %v2596_v1 = vadd.f32 %v1954_v36, %v1232_v39 }
 0x720   :  { %v1958_v38 = vpop.f32.mrb[26].mxu1  ;;  %v2598_v42 = vadd.f32 %v1956_v37, %v1236_v0 }
 0x721   :  { %v1959_v41 = vpop.f32.mrb[27].mxu1 }
 0x726   :  { %v2036_v44 = vpop.f32.mrb[28].mxu0 }
 0x727   :  { %v3653_v43 = vadd.f32 %v2596_v1, %v2036_v44  ;;  %v2038_v45 = vpop.f32.mrb[29].mxu0 }
 0x728   :  { %v2599_v46 = vadd.f32 %v2598_v42, %v2038_v45  ;;  %v2040_v47 = vpop.f32.mrb[30].mxu0 }
 0x729   :  { %v2061_v48 = vand.u32 2147483647, %v3653_v43  ;;  %v2041_v49 = vpop.f32.mrb[31].mxu0  ;;  %v2045_v50 = vmin.f32 %v3653_v43, 6.9077554 }
 0x72a   :  { %v2495_v51 = vmul.f32 -1.442695, %v2599_v46 }
 0x72b   :  { %v2062_v52 = vsub.f32 0.0, %v2061_v48  ;;  %v2046_v32 = vmul.f32 1.442695, %v2045_v50 }
 0x72c   :  { %2884 = vpow2.f32 %v2495_v51 }
 0x72d   :  { %v2063_v53 = vmul.f32 1.442695, %v2062_v52  ;;  %2886 = vpow2.f32 %v2046_v32 }
 0x72f   :  { %2888 = vpow2.f32 %v2063_v53 }
 0x736   :  { %v2885_v31 = vpop.eup %2884 }
 0x737   :  { %v2887_v34 = vpop.eup %2886  ;;  %v2081_v54 = vadd.f32 1.0, %v2885_v31 }
 0x738   :  { %v2048_v55 = vmax.f32 %v2887_v34, 0.001 }
 0x739   :  { %v2889_v56 = vpop.eup %2888  ;;  %2890 = vrcp.f32 %v2081_v54 }
 0x73a   :  { %v2065_v57 = vadd.f32 1.0, %v2889_v56  ;;  %v2049_v58 = vmin.f32 %v2048_v55, 1000.0  ;;  %v2068_v60 = vmul.f32 -0.5, %v2889_v56  ;;  %v2071_v63 = vand.u32 2147483647, %v2889_v56 }
 0x73c   :  { %2892 = vlog2.f32 %v2065_v57  ;;  %v2057_v59 = vmul.f32 %v3444_v7, %v2049_v58  ;;  %v2069_v62 = vadd.f32 1.0, %v2068_v60 }
 0x73e   :  { %2110 = vst.msk [vmem:[#allocation12] sm:$0xff] %vm180_vm1, %v2057_v59  ;;  %v2070_v4 = vmul.f32 %v2889_v56, %v2069_v62 }
 0x743   :  { %v2891_v61 = vpop.eup %2890 }
 0x744   :  { %2116 = vst.msk [vmem:[#allocation15] sm:$0xff] %vm180_vm1, %v2891_v61 }
 0x746   :  { %v2893_v2 = vpop.eup %2892 }
 0x747   :  { %v2067_v3 = vmul.f32 0.6931472, %v2893_v2 }
 0x748   :  { %2905 = shalt.err (!%p2902_p4)
}
 0x749   :  { %s3758_s10 = sld [smem:[#allocation33_spill]] }
 0x74f   :  { %s2906_s11 = scalar_lea.hbm %s3758_s10, 128 }
 0x750   :  { %p2907_p5 = scmp.ne.s32.totalorder %s3758_s10, %s2906_s11  ;;  %p2910_p6 = scmp.lt.u32.totalorder %s2906_s11, %s3758_s10 }
 0x752   :  { %p2912_p7 = pnand %p2910_p6, %p2907_p5 }
 0x754   :  { %2915 = shalt.err (!%p2912_p7)
}
 0x755   :  { %2150 = dma.vmem_to_hbm [thread:$0]  %s2148_s28, 128, %s3758_s10, [#allocation5]   ;;  %v2058_v7 = vmax.f32 %v3653_v43, 0.0  ;;  %vm2072_vm7 = vcmp.lt.f32.partialorder %v2071_v63, 0.0004427343 }
 0x756   :  { %s2916_s0 = scalar_lea.vmem %s3660_s2, 128  ;;  %p2921_p9 = scmp.lt.s32.totalorder %s3660_s2, %s3660_s2 }
 0x757   :  { %p2917_p8 = scmp.ne.s32.totalorder %s3660_s2, %s2916_s0  ;;  %p2922_p10 = scmp.lt.s32.totalorder %s2916_s0, %s2916_s0 }
 0x759   :  { %p2923_p11 = por %p2922_p10, %p2921_p9 }
 0x75b   :  { %p2924_p12 = pnand %p2923_p11, %p2917_p8 }
 0x75d   :  { %2927 = shalt.err (!%p2924_p12)
}
 0x75e   :  { %s3759_s5 = sld [smem:[#allocation35_spill]] }
 0x764   :  { %s2928_s9 = scalar_lea.hbm %s3759_s5, 128 }
 0x765   :  { %p2929_p13 = scmp.ne.s32.totalorder %s3759_s5, %s2928_s9  ;;  %p2932_p0 = scmp.lt.u32.totalorder %s2928_s9, %s3759_s5 }
 0x767   :  { %p2934_p1 = pnand %p2932_p0, %p2929_p13 }
 0x769   :  { %2937 = shalt.err (!%p2934_p1)
}
 0x76a   :  { %2170 = dma.vmem_to_hbm [thread:$0]  %s3660_s2, 128, %s3759_s5, [#allocation8]   ;;  %v2073_v5 = vsel %vm2072_vm7, %v2070_v4, %v2067_v3  ;;  %vm2059_vm8 = vcmp.ne.f32.partialorder %v3653_v43, %v3653_v43 }
 0x76b   :  { %v2074_v6 = vadd.f32 %v2073_v5, %v2058_v7  ;;  %s3155_s17 = smov [#allocation10]  }
 0x76c   :  { %s2187_s3 = sshll.u32 %s3155_s17, 4  ;;  %s2188_s3 = int_to_ptr.vmem [resolvable:$true] %s2187_s3 }
 0x76d   :  { %v2075_v8 = vsel %vm2059_vm8, %v3653_v43, %v2074_v6  ;;  %s2938_s8 = scalar_lea.vmem %s2188_s3, 128  ;;  %p2943_p3 = scmp.lt.s32.totalorder %s2188_s3, %s2188_s3 }
 0x76e   :  { %p2939_p2 = scmp.ne.s32.totalorder %s2188_s3, %s2938_s8  ;;  %p2944_p4 = scmp.lt.s32.totalorder %s2938_s8, %s2938_s8 }
 0x770   :  { %p2945_p5 = por %p2944_p4, %p2943_p3 }
 0x772   :  { %p2946_p6 = pnand %p2945_p5, %p2939_p2 }
 0x774   :  { %2949 = shalt.err (!%p2946_p6)
}
 0x775   :  { %s3760_s13 = sld [smem:[#allocation37_spill]] }
 0x77b   :  { %s2950_s6 = scalar_lea.hbm %s3760_s13, 128 }
 0x77c   :  { %p2951_p7 = scmp.ne.s32.totalorder %s3760_s13, %s2950_s6  ;;  %p2954_p8 = scmp.lt.u32.totalorder %s2950_s6, %s3760_s13 }
 0x77e   :  { %p2956_p9 = pnand %p2954_p8, %p2951_p7 }
 0x780   :  { %2959 = shalt.err (!%p2956_p9)
}
 0x781   :  { %2190 = dma.vmem_to_hbm [thread:$0]  %s2188_s3, 128, %s3760_s13, [#allocation11]   ;;  %v2076_v9 = vmax.f32 %v2075_v8, 0.001 }
 0x782   :  { %s3156_s30 = smov [#allocation2]   ;;  %s3157_s14 = smov [#allocation6]  }
 0x783   :  { %s2137_s21 = sshll.u32 %s3156_s30, 4  ;;  %s2157_s12 = sshll.u32 %s3157_s14, 4  ;;  %v2077_v10 = vmin.f32 %v2076_v9, 1000.0  ;;  %s2138_s21 = int_to_ptr.vmem [resolvable:$true] %s2137_s21  ;;  %s2158_s12 = int_to_ptr.vmem [resolvable:$true] %s2157_s12 }
 0x784   :  { %s2960_s25 = scalar_lea.vmem %s2138_s21, 128  ;;  %p2965_p11 = scmp.lt.s32.totalorder %s2138_s21, %s2138_s21 }
 0x785   :  { %p2961_p10 = scmp.ne.s32.totalorder %s2138_s21, %s2960_s25  ;;  %p2966_p12 = scmp.lt.s32.totalorder %s2960_s25, %s2960_s25 }
 0x787   :  { %p2967_p13 = por %p2966_p12, %p2965_p11 }
 0x789   :  { %p2968_p0 = pnand %p2967_p13, %p2961_p10 }
 0x78b   :  { %2971 = shalt.err (!%p2968_p0)
}
 0x78c   :  { %s3761_s24 = sld [smem:[#allocation32_spill]] }
 0x792   :  { %s2972_s20 = scalar_lea.hbm %s3761_s24, 128 }
 0x793   :  { %p2973_p1 = scmp.ne.s32.totalorder %s3761_s24, %s2972_s20  ;;  %p2976_p2 = scmp.lt.u32.totalorder %s2972_s20, %s3761_s24 }
 0x795   :  { %p2978_p3 = pnand %p2976_p2, %p2973_p1 }
 0x797   :  { %2981 = shalt.err (!%p2978_p3)
}
 0x798   :  { %2140 = dma.vmem_to_hbm [thread:$0]  %s2138_s21, 128, %s3761_s24, [#allocation3]   ;;  %2112 = vrot.lane.b32.xlu0 %v2077_v10, %s3150_s19 }
 0x799   :  { %s2982_s4 = scalar_lea.vmem %s2158_s12, 128  ;;  %p2987_p5 = scmp.lt.s32.totalorder %s2158_s12, %s2158_s12 }
 0x79a   :  { %p2983_p4 = scmp.ne.s32.totalorder %s2158_s12, %s2982_s4  ;;  %p2988_p6 = scmp.lt.s32.totalorder %s2982_s4, %s2982_s4 }
 0x79c   :  { %p2989_p7 = por %p2988_p6, %p2987_p5 }
 0x79e   :  { %p2990_p8 = pnand %p2989_p7, %p2983_p4 }
 0x7a0   :  { %2993 = shalt.err (!%p2990_p8)
}
 0x7a1   :  { %s3762_s15 = sld [smem:[#allocation34_spill]] }
 0x7a7   :  { %s2994_s16 = scalar_lea.hbm %s3762_s15, 128 }
 0x7a8   :  { %p2995_p9 = scmp.ne.s32.totalorder %s3762_s15, %s2994_s16  ;;  %p2998_p10 = scmp.lt.u32.totalorder %s2994_s16, %s3762_s15 }
 0x7aa   :  { %p3000_p11 = pnand %p2998_p10, %p2995_p9 }
 0x7ac   :  { %3003 = shalt.err (!%p3000_p11)
}
 0x7ad   :  { %2160 = dma.vmem_to_hbm [thread:$0]  %s2158_s12, 128, %s3762_s15, [#allocation5]   ;;  %2123 = vrot.lane.b32.xlu0 %v3400_v26, %s3150_s19 }
 0x7ae   :  { %s3158_s18 = smov [#allocation9]   ;;  %s3159_s23 = smov [#allocation12]  }
 0x7af   :  { %s2177_s22 = sshll.u32 %s3158_s18, 4  ;;  %s2201_s26 = sshll.u32 %s3159_s23, 4  ;;  %s2178_s22 = int_to_ptr.vmem [resolvable:$true] %s2177_s22  ;;  %s2202_s26 = int_to_ptr.vmem [resolvable:$true] %s2201_s26 }
 0x7b0   :  { %s3004_s28 = scalar_lea.vmem %s2178_s22, 128  ;;  %p3009_p13 = scmp.lt.s32.totalorder %s2178_s22, %s2178_s22 }
 0x7b1   :  { %p3005_p12 = scmp.ne.s32.totalorder %s2178_s22, %s3004_s28  ;;  %p3010_p0 = scmp.lt.s32.totalorder %s3004_s28, %s3004_s28 }
 0x7b3   :  { %p3011_p1 = por %p3010_p0, %p3009_p13 }
 0x7b5   :  { %p3012_p2 = pnand %p3011_p1, %p3005_p12 }
 0x7b7   :  { %3015 = shalt.err (!%p3012_p2)
}
 0x7b8   :  { %s3763_s1 = sld [smem:[#allocation36_spill]] }
 0x7be   :  { %s3016_s2 = scalar_lea.hbm %s3763_s1, 128 }
 0x7bf   :  { %p3017_p3 = scmp.ne.s32.totalorder %s3763_s1, %s3016_s2  ;;  %p3020_p4 = scmp.lt.u32.totalorder %s3016_s2, %s3763_s1 }
 0x7c1   :  { %p3022_p5 = pnand %p3020_p4, %p3017_p3 }
 0x7c3   :  { %3025 = shalt.err (!%p3022_p5)
}
 0x7c4   :  { %2180 = dma.vmem_to_hbm [thread:$0]  %s2178_s22, 128, %s3763_s1, [#allocation8]  }
 0x7c5   :  { %s3026_s7 = scalar_lea.vmem %s2202_s26, 128  ;;  %p3031_p7 = scmp.lt.s32.totalorder %s2202_s26, %s2202_s26 }
 0x7c6   :  { %p3027_p6 = scmp.ne.s32.totalorder %s2202_s26, %s3026_s7  ;;  %p3032_p8 = scmp.lt.s32.totalorder %s3026_s7, %s3026_s7 }
 0x7c8   :  { %p3033_p9 = por %p3032_p8, %p3031_p7 }
 0x7ca   :  { %p3034_p10 = pnand %p3033_p9, %p3027_p6 }
 0x7cc   :  { %3037 = shalt.err (!%p3034_p10)
}
 0x7cd   :  { %s3764_s19 = sld [smem:[#allocation40_spill]] }
 0x7d3   :  { %s3038_s10 = scalar_lea.hbm %s3764_s19, 128 }
 0x7d4   :  { %p3039_p11 = scmp.ne.s32.totalorder %s3764_s19, %s3038_s10  ;;  %p3042_p12 = scmp.lt.u32.totalorder %s3038_s10, %s3764_s19 }
 0x7d6   :  { %p3044_p13 = pnand %p3042_p12, %p3039_p11 }
 0x7d8   :  { %3047 = shalt.err (!%p3044_p13)
}
 0x7d9   :  { %2204 = dma.vmem_to_hbm [thread:$0]  %s2202_s26, 128, %s3764_s19, [#allocation11]  }
 0x7da   :  { %s3160_s11 = smov [#allocation13]   ;;  %s3161_s5 = smov [#allocation15]  }
 0x7db   :  { %s2211_s0 = sshll.u32 %s3160_s11, 4  ;;  %s2221_s9 = sshll.u32 %s3161_s5, 4  ;;  %s2212_s0 = int_to_ptr.vmem [resolvable:$true] %s2211_s0  ;;  %s2222_s9 = int_to_ptr.vmem [resolvable:$true] %s2221_s9 }
 0x7dc   :  { %s3048_s17 = scalar_lea.vmem %s2212_s0, 128  ;;  %p3053_p1 = scmp.lt.s32.totalorder %s2212_s0, %s2212_s0 }
 0x7dd   :  { %p3049_p0 = scmp.ne.s32.totalorder %s2212_s0, %s3048_s17  ;;  %p3054_p2 = scmp.lt.s32.totalorder %s3048_s17, %s3048_s17 }
 0x7df   :  { %p3055_p3 = por %p3054_p2, %p3053_p1 }
 0x7e1   :  { %p3056_p4 = pnand %p3055_p3, %p3049_p0 }
 0x80a   :  { %v2113_v26 = vpop.permute.xlu0 %2112 }
 0x80b   :  { %2115 = vst.msk [vmem:[#allocation13] sm:$0xff] %vm180_vm1, %v2113_v26 }
 0x80c   :  { %3059 = shalt.err (!%p3056_p4)
}
 0x80d   :  { %s3765_s3 = sld [smem:[#allocation41_spill]] }
 0x813   :  { %s3060_s8 = scalar_lea.hbm %s3765_s3, 128 }
 0x814   :  { %p3061_p5 = scmp.ne.s32.totalorder %s3765_s3, %s3060_s8  ;;  %p3064_p6 = scmp.lt.u32.totalorder %s3060_s8, %s3765_s3 }
 0x816   :  { %p3066_p7 = pnand %p3064_p6, %p3061_p5 }
 0x818   :  { %3069 = shalt.err (!%p3066_p7)
}
 0x819   :  { %2214 = dma.vmem_to_hbm [thread:$0]  %s2212_s0, 128, %s3765_s3, [#allocation14]  }
 0x81a   :  { %s3070_s13 = scalar_lea.vmem %s2222_s9, 128  ;;  %p3075_p9 = scmp.lt.s32.totalorder %s2222_s9, %s2222_s9 }
 0x81b   :  { %p3071_p8 = scmp.ne.s32.totalorder %s2222_s9, %s3070_s13  ;;  %p3076_p10 = scmp.lt.s32.totalorder %s3070_s13, %s3070_s13 }
 0x81d   :  { %p3077_p11 = por %p3076_p10, %p3075_p9 }
 0x81f   :  { %p3078_p12 = pnand %p3077_p11, %p3071_p8 }
 0x821   :  { %3081 = shalt.err (!%p3078_p12)
}
 0x822   :  { %s3082_s6 = scalar_lea.hbm %s3345_s27, 128 }
 0x823   :  { %p3083_p13 = scmp.ne.s32.totalorder %s3345_s27, %s3082_s6  ;;  %p3086_p0 = scmp.lt.u32.totalorder %s3082_s6, %s3345_s27 }
 0x825   :  { %p3088_p1 = pnand %p3086_p0, %p3083_p13 }
 0x827   :  { %3091 = shalt.err (!%p3088_p1)
}
 0x828   :  { %2224 = dma.vmem_to_hbm [thread:$0]  %s2222_s9, 128, %s3345_s27, [#allocation14]   ;;  %v2124_v11 = vpop.permute.xlu0 %2123 }
 0x829   :  { %2126 = vst.msk [vmem:[%s3355_s29] sm:$0xff] %vm2121_vm5, %v2124_v11 }
 0x82a   :  { %3092 = dma.done.wait [#allocation3], 128  }
 0x82b   :  { %3093 = vsyncadd [#allocation3], 4294967168 }
 0x82c   :  { %3094 = dma.done.wait [#allocation5], 256  }
 0x82d   :  { %3095 = vsyncadd [#allocation5], 4294967040 }
 0x82e   :  { %3096 = dma.done.wait [#allocation8], 256  }
 0x82f   :  { %3097 = vsyncadd [#allocation8], 4294967040 }
 0x830   :  { %3098 = dma.done.wait [#allocation11], 256  }
 0x831   :  { %3099 = vsyncadd [#allocation11], 4294967040 }
 0x832   :  { %3100 = dma.done.wait [#allocation14], 256  }
 0x833   :  { %3101 = vsyncadd [#allocation14], 4294967040 }
 0x834   :  { %2268 = vsyncpa [#allocation3], 1 }
 0x835   :  { %2269 = vsyncpa [#allocation5], 1 }
 0x836   :  { %2270 = vsyncpa [#allocation8], 1 }
 0x837   :  { %2271 = vsyncpa [#allocation11], 1 }
 0x838   :  { %2272 = vsyncpa [#allocation14], 1 }

</bundles_post_ra>
